<compile_context>
chip_gen: v5e
topology: v5e:2x2
jax: 0.10.0
libtpu: 0.0.40
codegen_flags: <defaults>
</compile_context>

<pallas_src>
import jax
import jax.numpy as jnp
from jax.experimental import pallas as pl


# ------------------------------ Fused model kernel ------------------------------
def _make_fused_kernel(T, Bp, D, H, L):
    """Kernel computing L LSTM layers (wavefront over T+L-1 steps) + linear head."""

    def kernel(*refs):
        x_ref = refs[0]                              # (T*Bp, D)   bf16, time-major
        layer_refs = refs[1:1 + 3 * L]               # per layer: wih_T(bf16), whh_T(bf16), b(f32)
        w_out_ref = refs[1 + 3 * L]                  # (1, H) f32
        b_out_ref = refs[2 + 3 * L]                  # (1, 1) f32
        y_ref = refs[3 + 3 * L]                      # (Bp, 1) f32

        # Hoist all weight/bias loads once (tiny; live in vregs / re-materialized).
        wih = [layer_refs[3 * l][...] for l in range(L)]
        whh = [layer_refs[3 * l + 1][...] for l in range(L)]
        bias = [layer_refs[3 * l + 2][...] for l in range(L)]

        # Layer-0 input projection hoisted out of the recurrence: one bf16 MXU push
        # over the whole sequence, bias folded in, f32 accumulation.
        xp0 = (jnp.dot(x_ref[...], wih[0], preferred_element_type=jnp.float32)
               + bias[0])                             # (T*Bp, 4H) f32

        def cell(l, gin, h_l, c_l):
            # dot first, add second (v7x MRB can fold the add into the result path).
            gates = jnp.dot(h_l.astype(jnp.bfloat16), whh[l],
                            preferred_element_type=jnp.float32) + gin        # (Bp, 4H)
            # At H=32, 4H=128: one sigmoid + one tanh EUP push over the full vreg,
            # then static lane slices for i/f/g/o.
            sg = jax.nn.sigmoid(gates)
            th = jnp.tanh(gates)
            i_g = sg[:, 0 * H:1 * H]
            f_g = sg[:, 1 * H:2 * H]
            g_g = th[:, 2 * H:3 * H]
            o_g = sg[:, 3 * H:4 * H]
            c_n = f_g * c_l + i_g * g_g
            h_n = o_g * jnp.tanh(c_n)
            return h_n, c_n

        h = [jnp.zeros((Bp, H), jnp.float32) for _ in range(L)]
        c = [jnp.zeros((Bp, H), jnp.float32) for _ in range(L)]

        # Wavefront: step s runs layer l at time t = s - l.  Layers are visited
        # top-down within a step so h[l-1] read here is still layer l-1's output
        # at time t (written at step s-1).  All state stays in vregs -- no VMEM
        # scratch, no inter-layer HBM/VMEM traffic.
        for s in range(T + L - 1):
            for l in range(L - 1, -1, -1):
                t = s - l
                if 0 <= t < T:
                    if l == 0:
                        gin = xp0[t * Bp:(t + 1) * Bp, :]   # whole (8,128)-tile slice
                    else:
                        gin = (jnp.dot(h[l - 1].astype(jnp.bfloat16), wih[l],
                                       preferred_element_type=jnp.float32)
                               + bias[l])
                    h[l], c[l] = cell(l, gin, h[l], c[l])

        # out[:, -1, :] of the last layer == final h[L-1].
        # Head: N=1 matmul replaced by VPU multiply + lane reduction.
        # TODO(synk): nn.Dropout is identity in eval mode; training-time dropout not modeled.
        y_ref[...] = (jnp.sum(h[L - 1] * w_out_ref[...], axis=-1, keepdims=True)
                      + b_out_ref[...])

    return kernel


def cudalstm_forward(x, params):
    """x: (batch, time, input_size) float32 -> {'y_hat': (batch, 1) float32}."""
    B, T, D = x.shape
    H = params["lstm"][0][1].shape[0]                # whh_T is (H, 4H)
    L = len(params["lstm"])
    Bp = ((B + 7) // 8) * 8                          # pad batch to a full sublane tile

    # Time-major, zero-padded to Bp rows per timestep, flattened so row t*Bp + b == x[b, t].
    x_tm = jnp.transpose(x, (1, 0, 2)).astype(jnp.float32)          # (T, B, D)
    x_tm = jnp.pad(x_tm, ((0, 0), (0, Bp - B), (0, 0)))             # (T, Bp, D)
    x_flat = x_tm.reshape(T * Bp, D).astype(jnp.bfloat16)           # (T*Bp, D) bf16

    ins = [x_flat]
    for (wih_T, whh_T, b) in params["lstm"]:
        ins += [wih_T.astype(jnp.bfloat16),          # (D_in, 4H) bf16 (MXU-native)
                whh_T.astype(jnp.bfloat16),          # (H, 4H)    bf16
                b.astype(jnp.float32)]               # (1, 4H)    f32
    ins += [params["w_out"].astype(jnp.float32),     # (1, H)
            params["b_out"].astype(jnp.float32)]     # (1, 1)

    # Gridless single invocation; every operand is one full-array block in VMEM.
    in_specs = [pl.BlockSpec(a.shape, lambda: (0, 0)) for a in ins]

    y = pl.pallas_call(
        _make_fused_kernel(T, Bp, D, H, L),
        out_shape=jax.ShapeDtypeStruct((Bp, 1), jnp.float32),
        in_specs=in_specs,
        out_specs=pl.BlockSpec((Bp, 1), lambda: (0, 0)),
    )(*ins)
    return {"y_hat": y[:B]}


# ---------------------------- Parameter construction ----------------------------
def init_params(key, input_size, hidden_size, num_layers):
    """PyTorch nn.LSTM / nn.Linear style uniform(-1/sqrt(H), 1/sqrt(H)) init.

    Weights are stored pre-transposed (contraction dim first): w_ih -> (D_in, 4H),
    w_hh -> (H, 4H).  The head weight is kept as a (1, H) row for the in-kernel
    VPU-multiply + lane-reduce head.  Kept in f32 here; the wrapper casts the
    matmul operands to bf16.
    """
    params = {"lstm": []}
    k = 1.0 / jnp.sqrt(jnp.float32(hidden_size))
    for layer in range(num_layers):
        d_in = input_size if layer == 0 else hidden_size
        key, k1, k2, k3, k4 = jax.random.split(key, 5)
        w_ih = jax.random.uniform(k1, (4 * hidden_size, d_in), jnp.float32, -k, k)
        w_hh = jax.random.uniform(k2, (4 * hidden_size, hidden_size), jnp.float32, -k, k)
        b_ih = jax.random.uniform(k3, (4 * hidden_size,), jnp.float32, -k, k)
        b_hh = jax.random.uniform(k4, (4 * hidden_size,), jnp.float32, -k, k)
        params["lstm"].append(
            (w_ih.T, w_hh.T, (b_ih + b_hh).reshape(1, 4 * hidden_size)))
    key, k5, k6 = jax.random.split(key, 3)
    params["w_out"] = jax.random.uniform(k5, (1, hidden_size), jnp.float32, -k, k)
    params["b_out"] = jax.random.uniform(k6, (1, 1), jnp.float32, -k, k)
    return params


# ------------------------------ Pure-JAX reference ------------------------------
def _reference_forward(x, params):
    B, T, D = x.shape
    H = params["lstm"][0][1].shape[0]
    seq = jnp.transpose(x, (1, 0, 2)).astype(jnp.float32)   # (T, B, D)
    for (wih_T, whh_T, b) in params["lstm"]:
        h = jnp.zeros((B, H), jnp.float32)
        c = jnp.zeros((B, H), jnp.float32)
        outs = []
        for t in range(T):
            gates = seq[t] @ wih_T + h @ whh_T + b
            i = jax.nn.sigmoid(gates[:, 0 * H:1 * H])
            f = jax.nn.sigmoid(gates[:, 1 * H:2 * H])
            g = jnp.tanh(gates[:, 2 * H:3 * H])
            o = jax.nn.sigmoid(gates[:, 3 * H:4 * H])
            c = f * c + i * g
            h = o * jnp.tanh(c)
            outs.append(h)
        seq = jnp.stack(outs, axis=0)
    return seq[-1] @ params["w_out"].T + params["b_out"]


if __name__ == "__main__":
    # hyperparameters: input_size_lstm=8, hidden_size=32, no_of_layers=2, drop_out_rate=0.4
    B, T, D, H, L = 2, 8, 8, 32, 2

    key = jax.random.PRNGKey(0)
    key, kx = jax.random.split(key)
    x = jax.random.normal(kx, (B, T, D), dtype=jnp.float32)

    params = init_params(key, input_size=D, hidden_size=H, num_layers=L)

    out = cudalstm_forward(x, params)
    y = jax.block_until_ready(out["y_hat"])
    assert y.shape == (B, 1) and y.dtype == jnp.float32

    # f32 reference; relaxed tolerance accounts for bf16 MXU operands (f32 accumulation).
    y_ref = jax.block_until_ready(_reference_forward(x, params))
    assert jnp.allclose(y, y_ref, atol=2e-2, rtol=2e-2), "mismatch vs pure-JAX reference"
    print("KERNEL_OK")
</pallas_src>

<mosaic_0001>
module attributes {stable_mosaic.version = 11 : i64} {
  func.func @kernel(%arg0: memref<64x8xbf16, #tpu.memory_space<vmem>>, %arg1: memref<8x128xbf16, #tpu.memory_space<vmem>>, %arg2: memref<32x128xbf16, #tpu.memory_space<vmem>>, %arg3: memref<1x128xf32, #tpu.memory_space<vmem>>, %arg4: memref<32x128xbf16, #tpu.memory_space<vmem>>, %arg5: memref<32x128xbf16, #tpu.memory_space<vmem>>, %arg6: memref<1x128xf32, #tpu.memory_space<vmem>>, %arg7: memref<1x32xf32, #tpu.memory_space<vmem>>, %arg8: memref<1x1xf32, #tpu.memory_space<vmem>>, %arg9: memref<8x1xf32, #tpu.memory_space<vmem>>) attributes {dimension_semantics = [], scalar_prefetch = 0 : i64, scratch_operands = 0 : i64, tpu.core_type = #tpu.core_type<tc>} {
    %c0 = arith.constant 0 : index
    %c0_0 = arith.constant 0 : index
    %0 = vector.load %arg1[%c0, %c0_0] : memref<8x128xbf16, #tpu.memory_space<vmem>>, vector<8x128xbf16>
    %c0_1 = arith.constant 0 : index
    %c0_2 = arith.constant 0 : index
    %1 = vector.load %arg4[%c0_1, %c0_2] : memref<32x128xbf16, #tpu.memory_space<vmem>>, vector<32x128xbf16>
    %c0_3 = arith.constant 0 : index
    %c0_4 = arith.constant 0 : index
    %2 = vector.load %arg2[%c0_3, %c0_4] : memref<32x128xbf16, #tpu.memory_space<vmem>>, vector<32x128xbf16>
    %c0_5 = arith.constant 0 : index
    %c0_6 = arith.constant 0 : index
    %3 = vector.load %arg5[%c0_5, %c0_6] : memref<32x128xbf16, #tpu.memory_space<vmem>>, vector<32x128xbf16>
    %c0_7 = arith.constant 0 : index
    %c0_8 = arith.constant 0 : index
    %4 = vector.load %arg3[%c0_7, %c0_8] : memref<1x128xf32, #tpu.memory_space<vmem>>, vector<1x128xf32>
    %c0_9 = arith.constant 0 : index
    %c0_10 = arith.constant 0 : index
    %5 = vector.load %arg6[%c0_9, %c0_10] : memref<1x128xf32, #tpu.memory_space<vmem>>, vector<1x128xf32>
    %c0_11 = arith.constant 0 : index
    %c0_12 = arith.constant 0 : index
    %6 = vector.load %arg0[%c0_11, %c0_12] : memref<64x8xbf16, #tpu.memory_space<vmem>>, vector<64x8xbf16>
    %cst = arith.constant dense<0.000000e+00> : vector<64x128xf32>
    %7 = tpu.matmul %6, %0, %cst {dimension_numbers = #tpu.dot_dimension_numbers<[1], [0], [0], [1], [0, 0, 1, 1], [], []>} : vector<64x8xbf16>, vector<8x128xbf16>, vector<64x128xf32> -> vector<64x128xf32>
    %8 = vector.broadcast %4 : vector<1x128xf32> to vector<64x128xf32>
    %9 = arith.addf %7, %8 : vector<64x128xf32>
    %cst_13 = arith.constant 0.000000e+00 : f32
    %10 = vector.broadcast %cst_13 : f32 to vector<8x32xf32>
    %cst_14 = arith.constant 0.000000e+00 : f32
    %11 = vector.broadcast %cst_14 : f32 to vector<8x32xf32>
    %cst_15 = arith.constant 0.000000e+00 : f32
    %12 = vector.broadcast %cst_15 : f32 to vector<8x32xf32>
    %cst_16 = arith.constant 0.000000e+00 : f32
    %13 = vector.broadcast %cst_16 : f32 to vector<8x32xf32>
    %14 = vector.extract_strided_slice %9 {offsets = [0, 0], sizes = [8, 128], strides = [1, 1]} : vector<64x128xf32> to vector<8x128xf32>
    %15 = arith.truncf %10 : vector<8x32xf32> to vector<8x32xbf16>
    %cst_17 = arith.constant dense<0.000000e+00> : vector<8x128xf32>
    %16 = tpu.matmul %15, %2, %cst_17 {dimension_numbers = #tpu.dot_dimension_numbers<[1], [0], [0], [1], [0, 0, 1, 1], [], []>} : vector<8x32xbf16>, vector<32x128xbf16>, vector<8x128xf32> -> vector<8x128xf32>
    %17 = arith.addf %16, %14 : vector<8x128xf32>
    %18 = arith.negf %17 : vector<8x128xf32>
    %19 = math.exp %18 : vector<8x128xf32>
    %cst_18 = arith.constant 1.000000e+00 : f32
    %20 = vector.broadcast %cst_18 : f32 to vector<8x128xf32>
    %21 = arith.addf %20, %19 : vector<8x128xf32>
    %22 = arith.divf %20, %21 : vector<8x128xf32>
    %23 = math.tanh %17 : vector<8x128xf32>
    %24 = vector.extract_strided_slice %22 {offsets = [0, 0], sizes = [8, 32], strides = [1, 1]} : vector<8x128xf32> to vector<8x32xf32>
    %25 = vector.extract_strided_slice %22 {offsets = [0, 32], sizes = [8, 32], strides = [1, 1]} : vector<8x128xf32> to vector<8x32xf32>
    %26 = vector.extract_strided_slice %23 {offsets = [0, 64], sizes = [8, 32], strides = [1, 1]} : vector<8x128xf32> to vector<8x32xf32>
    %27 = vector.extract_strided_slice %22 {offsets = [0, 96], sizes = [8, 32], strides = [1, 1]} : vector<8x128xf32> to vector<8x32xf32>
    %28 = arith.mulf %25, %12 : vector<8x32xf32>
    %29 = arith.mulf %24, %26 : vector<8x32xf32>
    %30 = arith.addf %28, %29 : vector<8x32xf32>
    %31 = math.tanh %30 : vector<8x32xf32>
    %32 = arith.mulf %27, %31 : vector<8x32xf32>
    %33 = arith.truncf %32 : vector<8x32xf32> to vector<8x32xbf16>
    %cst_19 = arith.constant dense<0.000000e+00> : vector<8x128xf32>
    %34 = tpu.matmul %33, %1, %cst_19 {dimension_numbers = #tpu.dot_dimension_numbers<[1], [0], [0], [1], [0, 0, 1, 1], [], []>} : vector<8x32xbf16>, vector<32x128xbf16>, vector<8x128xf32> -> vector<8x128xf32>
    %35 = vector.broadcast %5 : vector<1x128xf32> to vector<8x128xf32>
    %36 = arith.addf %34, %35 : vector<8x128xf32>
    %37 = arith.truncf %11 : vector<8x32xf32> to vector<8x32xbf16>
    %cst_20 = arith.constant dense<0.000000e+00> : vector<8x128xf32>
    %38 = tpu.matmul %37, %3, %cst_20 {dimension_numbers = #tpu.dot_dimension_numbers<[1], [0], [0], [1], [0, 0, 1, 1], [], []>} : vector<8x32xbf16>, vector<32x128xbf16>, vector<8x128xf32> -> vector<8x128xf32>
    %39 = arith.addf %38, %36 : vector<8x128xf32>
    %40 = arith.negf %39 : vector<8x128xf32>
    %41 = math.exp %40 : vector<8x128xf32>
    %cst_21 = arith.constant 1.000000e+00 : f32
    %42 = vector.broadcast %cst_21 : f32 to vector<8x128xf32>
    %43 = arith.addf %42, %41 : vector<8x128xf32>
    %44 = arith.divf %42, %43 : vector<8x128xf32>
    %45 = math.tanh %39 : vector<8x128xf32>
    %46 = vector.extract_strided_slice %44 {offsets = [0, 0], sizes = [8, 32], strides = [1, 1]} : vector<8x128xf32> to vector<8x32xf32>
    %47 = vector.extract_strided_slice %44 {offsets = [0, 32], sizes = [8, 32], strides = [1, 1]} : vector<8x128xf32> to vector<8x32xf32>
    %48 = vector.extract_strided_slice %45 {offsets = [0, 64], sizes = [8, 32], strides = [1, 1]} : vector<8x128xf32> to vector<8x32xf32>
    %49 = vector.extract_strided_slice %44 {offsets = [0, 96], sizes = [8, 32], strides = [1, 1]} : vector<8x128xf32> to vector<8x32xf32>
    %50 = arith.mulf %47, %13 : vector<8x32xf32>
    %51 = arith.mulf %46, %48 : vector<8x32xf32>
    %52 = arith.addf %50, %51 : vector<8x32xf32>
    %53 = math.tanh %52 : vector<8x32xf32>
    %54 = arith.mulf %49, %53 : vector<8x32xf32>
    %55 = vector.extract_strided_slice %9 {offsets = [8, 0], sizes = [8, 128], strides = [1, 1]} : vector<64x128xf32> to vector<8x128xf32>
    %56 = arith.truncf %32 : vector<8x32xf32> to vector<8x32xbf16>
    %cst_22 = arith.constant dense<0.000000e+00> : vector<8x128xf32>
    %57 = tpu.matmul %56, %2, %cst_22 {dimension_numbers = #tpu.dot_dimension_numbers<[1], [0], [0], [1], [0, 0, 1, 1], [], []>} : vector<8x32xbf16>, vector<32x128xbf16>, vector<8x128xf32> -> vector<8x128xf32>
    %58 = arith.addf %57, %55 : vector<8x128xf32>
    %59 = arith.negf %58 : vector<8x128xf32>
    %60 = math.exp %59 : vector<8x128xf32>
    %cst_23 = arith.constant 1.000000e+00 : f32
    %61 = vector.broadcast %cst_23 : f32 to vector<8x128xf32>
    %62 = arith.addf %61, %60 : vector<8x128xf32>
    %63 = arith.divf %61, %62 : vector<8x128xf32>
    %64 = math.tanh %58 : vector<8x128xf32>
    %65 = vector.extract_strided_slice %63 {offsets = [0, 0], sizes = [8, 32], strides = [1, 1]} : vector<8x128xf32> to vector<8x32xf32>
    %66 = vector.extract_strided_slice %63 {offsets = [0, 32], sizes = [8, 32], strides = [1, 1]} : vector<8x128xf32> to vector<8x32xf32>
    %67 = vector.extract_strided_slice %64 {offsets = [0, 64], sizes = [8, 32], strides = [1, 1]} : vector<8x128xf32> to vector<8x32xf32>
    %68 = vector.extract_strided_slice %63 {offsets = [0, 96], sizes = [8, 32], strides = [1, 1]} : vector<8x128xf32> to vector<8x32xf32>
    %69 = arith.mulf %66, %30 : vector<8x32xf32>
    %70 = arith.mulf %65, %67 : vector<8x32xf32>
    %71 = arith.addf %69, %70 : vector<8x32xf32>
    %72 = math.tanh %71 : vector<8x32xf32>
    %73 = arith.mulf %68, %72 : vector<8x32xf32>
    %74 = arith.truncf %73 : vector<8x32xf32> to vector<8x32xbf16>
    %cst_24 = arith.constant dense<0.000000e+00> : vector<8x128xf32>
    %75 = tpu.matmul %74, %1, %cst_24 {dimension_numbers = #tpu.dot_dimension_numbers<[1], [0], [0], [1], [0, 0, 1, 1], [], []>} : vector<8x32xbf16>, vector<32x128xbf16>, vector<8x128xf32> -> vector<8x128xf32>
    %76 = vector.broadcast %5 : vector<1x128xf32> to vector<8x128xf32>
    %77 = arith.addf %75, %76 : vector<8x128xf32>
    %78 = arith.truncf %54 : vector<8x32xf32> to vector<8x32xbf16>
    %cst_25 = arith.constant dense<0.000000e+00> : vector<8x128xf32>
    %79 = tpu.matmul %78, %3, %cst_25 {dimension_numbers = #tpu.dot_dimension_numbers<[1], [0], [0], [1], [0, 0, 1, 1], [], []>} : vector<8x32xbf16>, vector<32x128xbf16>, vector<8x128xf32> -> vector<8x128xf32>
    %80 = arith.addf %79, %77 : vector<8x128xf32>
    %81 = arith.negf %80 : vector<8x128xf32>
    %82 = math.exp %81 : vector<8x128xf32>
    %cst_26 = arith.constant 1.000000e+00 : f32
    %83 = vector.broadcast %cst_26 : f32 to vector<8x128xf32>
    %84 = arith.addf %83, %82 : vector<8x128xf32>
    %85 = arith.divf %83, %84 : vector<8x128xf32>
    %86 = math.tanh %80 : vector<8x128xf32>
    %87 = vector.extract_strided_slice %85 {offsets = [0, 0], sizes = [8, 32], strides = [1, 1]} : vector<8x128xf32> to vector<8x32xf32>
    %88 = vector.extract_strided_slice %85 {offsets = [0, 32], sizes = [8, 32], strides = [1, 1]} : vector<8x128xf32> to vector<8x32xf32>
    %89 = vector.extract_strided_slice %86 {offsets = [0, 64], sizes = [8, 32], strides = [1, 1]} : vector<8x128xf32> to vector<8x32xf32>
    %90 = vector.extract_strided_slice %85 {offsets = [0, 96], sizes = [8, 32], strides = [1, 1]} : vector<8x128xf32> to vector<8x32xf32>
    %91 = arith.mulf %88, %52 : vector<8x32xf32>
    %92 = arith.mulf %87, %89 : vector<8x32xf32>
    %93 = arith.addf %91, %92 : vector<8x32xf32>
    %94 = math.tanh %93 : vector<8x32xf32>
    %95 = arith.mulf %90, %94 : vector<8x32xf32>
    %96 = vector.extract_strided_slice %9 {offsets = [16, 0], sizes = [8, 128], strides = [1, 1]} : vector<64x128xf32> to vector<8x128xf32>
    %97 = arith.truncf %73 : vector<8x32xf32> to vector<8x32xbf16>
    %cst_27 = arith.constant dense<0.000000e+00> : vector<8x128xf32>
    %98 = tpu.matmul %97, %2, %cst_27 {dimension_numbers = #tpu.dot_dimension_numbers<[1], [0], [0], [1], [0, 0, 1, 1], [], []>} : vector<8x32xbf16>, vector<32x128xbf16>, vector<8x128xf32> -> vector<8x128xf32>
    %99 = arith.addf %98, %96 : vector<8x128xf32>
    %100 = arith.negf %99 : vector<8x128xf32>
    %101 = math.exp %100 : vector<8x128xf32>
    %cst_28 = arith.constant 1.000000e+00 : f32
    %102 = vector.broadcast %cst_28 : f32 to vector<8x128xf32>
    %103 = arith.addf %102, %101 : vector<8x128xf32>
    %104 = arith.divf %102, %103 : vector<8x128xf32>
    %105 = math.tanh %99 : vector<8x128xf32>
    %106 = vector.extract_strided_slice %104 {offsets = [0, 0], sizes = [8, 32], strides = [1, 1]} : vector<8x128xf32> to vector<8x32xf32>
    %107 = vector.extract_strided_slice %104 {offsets = [0, 32], sizes = [8, 32], strides = [1, 1]} : vector<8x128xf32> to vector<8x32xf32>
    %108 = vector.extract_strided_slice %105 {offsets = [0, 64], sizes = [8, 32], strides = [1, 1]} : vector<8x128xf32> to vector<8x32xf32>
    %109 = vector.extract_strided_slice %104 {offsets = [0, 96], sizes = [8, 32], strides = [1, 1]} : vector<8x128xf32> to vector<8x32xf32>
    %110 = arith.mulf %107, %71 : vector<8x32xf32>
    %111 = arith.mulf %106, %108 : vector<8x32xf32>
    %112 = arith.addf %110, %111 : vector<8x32xf32>
    %113 = math.tanh %112 : vector<8x32xf32>
    %114 = arith.mulf %109, %113 : vector<8x32xf32>
    %115 = arith.truncf %114 : vector<8x32xf32> to vector<8x32xbf16>
    %cst_29 = arith.constant dense<0.000000e+00> : vector<8x128xf32>
    %116 = tpu.matmul %115, %1, %cst_29 {dimension_numbers = #tpu.dot_dimension_numbers<[1], [0], [0], [1], [0, 0, 1, 1], [], []>} : vector<8x32xbf16>, vector<32x128xbf16>, vector<8x128xf32> -> vector<8x128xf32>
    %117 = vector.broadcast %5 : vector<1x128xf32> to vector<8x128xf32>
    %118 = arith.addf %116, %117 : vector<8x128xf32>
    %119 = arith.truncf %95 : vector<8x32xf32> to vector<8x32xbf16>
    %cst_30 = arith.constant dense<0.000000e+00> : vector<8x128xf32>
    %120 = tpu.matmul %119, %3, %cst_30 {dimension_numbers = #tpu.dot_dimension_numbers<[1], [0], [0], [1], [0, 0, 1, 1], [], []>} : vector<8x32xbf16>, vector<32x128xbf16>, vector<8x128xf32> -> vector<8x128xf32>
    %121 = arith.addf %120, %118 : vector<8x128xf32>
    %122 = arith.negf %121 : vector<8x128xf32>
    %123 = math.exp %122 : vector<8x128xf32>
    %cst_31 = arith.constant 1.000000e+00 : f32
    %124 = vector.broadcast %cst_31 : f32 to vector<8x128xf32>
    %125 = arith.addf %124, %123 : vector<8x128xf32>
    %126 = arith.divf %124, %125 : vector<8x128xf32>
    %127 = math.tanh %121 : vector<8x128xf32>
    %128 = vector.extract_strided_slice %126 {offsets = [0, 0], sizes = [8, 32], strides = [1, 1]} : vector<8x128xf32> to vector<8x32xf32>
    %129 = vector.extract_strided_slice %126 {offsets = [0, 32], sizes = [8, 32], strides = [1, 1]} : vector<8x128xf32> to vector<8x32xf32>
    %130 = vector.extract_strided_slice %127 {offsets = [0, 64], sizes = [8, 32], strides = [1, 1]} : vector<8x128xf32> to vector<8x32xf32>
    %131 = vector.extract_strided_slice %126 {offsets = [0, 96], sizes = [8, 32], strides = [1, 1]} : vector<8x128xf32> to vector<8x32xf32>
    %132 = arith.mulf %129, %93 : vector<8x32xf32>
    %133 = arith.mulf %128, %130 : vector<8x32xf32>
    %134 = arith.addf %132, %133 : vector<8x32xf32>
    %135 = math.tanh %134 : vector<8x32xf32>
    %136 = arith.mulf %131, %135 : vector<8x32xf32>
    %137 = vector.extract_strided_slice %9 {offsets = [24, 0], sizes = [8, 128], strides = [1, 1]} : vector<64x128xf32> to vector<8x128xf32>
    %138 = arith.truncf %114 : vector<8x32xf32> to vector<8x32xbf16>
    %cst_32 = arith.constant dense<0.000000e+00> : vector<8x128xf32>
    %139 = tpu.matmul %138, %2, %cst_32 {dimension_numbers = #tpu.dot_dimension_numbers<[1], [0], [0], [1], [0, 0, 1, 1], [], []>} : vector<8x32xbf16>, vector<32x128xbf16>, vector<8x128xf32> -> vector<8x128xf32>
    %140 = arith.addf %139, %137 : vector<8x128xf32>
    %141 = arith.negf %140 : vector<8x128xf32>
    %142 = math.exp %141 : vector<8x128xf32>
    %cst_33 = arith.constant 1.000000e+00 : f32
    %143 = vector.broadcast %cst_33 : f32 to vector<8x128xf32>
    %144 = arith.addf %143, %142 : vector<8x128xf32>
    %145 = arith.divf %143, %144 : vector<8x128xf32>
    %146 = math.tanh %140 : vector<8x128xf32>
    %147 = vector.extract_strided_slice %145 {offsets = [0, 0], sizes = [8, 32], strides = [1, 1]} : vector<8x128xf32> to vector<8x32xf32>
    %148 = vector.extract_strided_slice %145 {offsets = [0, 32], sizes = [8, 32], strides = [1, 1]} : vector<8x128xf32> to vector<8x32xf32>
    %149 = vector.extract_strided_slice %146 {offsets = [0, 64], sizes = [8, 32], strides = [1, 1]} : vector<8x128xf32> to vector<8x32xf32>
    %150 = vector.extract_strided_slice %145 {offsets = [0, 96], sizes = [8, 32], strides = [1, 1]} : vector<8x128xf32> to vector<8x32xf32>
    %151 = arith.mulf %148, %112 : vector<8x32xf32>
    %152 = arith.mulf %147, %149 : vector<8x32xf32>
    %153 = arith.addf %151, %152 : vector<8x32xf32>
    %154 = math.tanh %153 : vector<8x32xf32>
    %155 = arith.mulf %150, %154 : vector<8x32xf32>
    %156 = arith.truncf %155 : vector<8x32xf32> to vector<8x32xbf16>
    %cst_34 = arith.constant dense<0.000000e+00> : vector<8x128xf32>
    %157 = tpu.matmul %156, %1, %cst_34 {dimension_numbers = #tpu.dot_dimension_numbers<[1], [0], [0], [1], [0, 0, 1, 1], [], []>} : vector<8x32xbf16>, vector<32x128xbf16>, vector<8x128xf32> -> vector<8x128xf32>
    %158 = vector.broadcast %5 : vector<1x128xf32> to vector<8x128xf32>
    %159 = arith.addf %157, %158 : vector<8x128xf32>
    %160 = arith.truncf %136 : vector<8x32xf32> to vector<8x32xbf16>
    %cst_35 = arith.constant dense<0.000000e+00> : vector<8x128xf32>
    %161 = tpu.matmul %160, %3, %cst_35 {dimension_numbers = #tpu.dot_dimension_numbers<[1], [0], [0], [1], [0, 0, 1, 1], [], []>} : vector<8x32xbf16>, vector<32x128xbf16>, vector<8x128xf32> -> vector<8x128xf32>
    %162 = arith.addf %161, %159 : vector<8x128xf32>
    %163 = arith.negf %162 : vector<8x128xf32>
    %164 = math.exp %163 : vector<8x128xf32>
    %cst_36 = arith.constant 1.000000e+00 : f32
    %165 = vector.broadcast %cst_36 : f32 to vector<8x128xf32>
    %166 = arith.addf %165, %164 : vector<8x128xf32>
    %167 = arith.divf %165, %166 : vector<8x128xf32>
    %168 = math.tanh %162 : vector<8x128xf32>
    %169 = vector.extract_strided_slice %167 {offsets = [0, 0], sizes = [8, 32], strides = [1, 1]} : vector<8x128xf32> to vector<8x32xf32>
    %170 = vector.extract_strided_slice %167 {offsets = [0, 32], sizes = [8, 32], strides = [1, 1]} : vector<8x128xf32> to vector<8x32xf32>
    %171 = vector.extract_strided_slice %168 {offsets = [0, 64], sizes = [8, 32], strides = [1, 1]} : vector<8x128xf32> to vector<8x32xf32>
    %172 = vector.extract_strided_slice %167 {offsets = [0, 96], sizes = [8, 32], strides = [1, 1]} : vector<8x128xf32> to vector<8x32xf32>
    %173 = arith.mulf %170, %134 : vector<8x32xf32>
    %174 = arith.mulf %169, %171 : vector<8x32xf32>
    %175 = arith.addf %173, %174 : vector<8x32xf32>
    %176 = math.tanh %175 : vector<8x32xf32>
    %177 = arith.mulf %172, %176 : vector<8x32xf32>
    %178 = vector.extract_strided_slice %9 {offsets = [32, 0], sizes = [8, 128], strides = [1, 1]} : vector<64x128xf32> to vector<8x128xf32>
    %179 = arith.truncf %155 : vector<8x32xf32> to vector<8x32xbf16>
    %cst_37 = arith.constant dense<0.000000e+00> : vector<8x128xf32>
    %180 = tpu.matmul %179, %2, %cst_37 {dimension_numbers = #tpu.dot_dimension_numbers<[1], [0], [0], [1], [0, 0, 1, 1], [], []>} : vector<8x32xbf16>, vector<32x128xbf16>, vector<8x128xf32> -> vector<8x128xf32>
    %181 = arith.addf %180, %178 : vector<8x128xf32>
    %182 = arith.negf %181 : vector<8x128xf32>
    %183 = math.exp %182 : vector<8x128xf32>
    %cst_38 = arith.constant 1.000000e+00 : f32
    %184 = vector.broadcast %cst_38 : f32 to vector<8x128xf32>
    %185 = arith.addf %184, %183 : vector<8x128xf32>
    %186 = arith.divf %184, %185 : vector<8x128xf32>
    %187 = math.tanh %181 : vector<8x128xf32>
    %188 = vector.extract_strided_slice %186 {offsets = [0, 0], sizes = [8, 32], strides = [1, 1]} : vector<8x128xf32> to vector<8x32xf32>
    %189 = vector.extract_strided_slice %186 {offsets = [0, 32], sizes = [8, 32], strides = [1, 1]} : vector<8x128xf32> to vector<8x32xf32>
    %190 = vector.extract_strided_slice %187 {offsets = [0, 64], sizes = [8, 32], strides = [1, 1]} : vector<8x128xf32> to vector<8x32xf32>
    %191 = vector.extract_strided_slice %186 {offsets = [0, 96], sizes = [8, 32], strides = [1, 1]} : vector<8x128xf32> to vector<8x32xf32>
    %192 = arith.mulf %189, %153 : vector<8x32xf32>
    %193 = arith.mulf %188, %190 : vector<8x32xf32>
    %194 = arith.addf %192, %193 : vector<8x32xf32>
    %195 = math.tanh %194 : vector<8x32xf32>
    %196 = arith.mulf %191, %195 : vector<8x32xf32>
    %197 = arith.truncf %196 : vector<8x32xf32> to vector<8x32xbf16>
    %cst_39 = arith.constant dense<0.000000e+00> : vector<8x128xf32>
    %198 = tpu.matmul %197, %1, %cst_39 {dimension_numbers = #tpu.dot_dimension_numbers<[1], [0], [0], [1], [0, 0, 1, 1], [], []>} : vector<8x32xbf16>, vector<32x128xbf16>, vector<8x128xf32> -> vector<8x128xf32>
    %199 = vector.broadcast %5 : vector<1x128xf32> to vector<8x128xf32>
    %200 = arith.addf %198, %199 : vector<8x128xf32>
    %201 = arith.truncf %177 : vector<8x32xf32> to vector<8x32xbf16>
    %cst_40 = arith.constant dense<0.000000e+00> : vector<8x128xf32>
    %202 = tpu.matmul %201, %3, %cst_40 {dimension_numbers = #tpu.dot_dimension_numbers<[1], [0], [0], [1], [0, 0, 1, 1], [], []>} : vector<8x32xbf16>, vector<32x128xbf16>, vector<8x128xf32> -> vector<8x128xf32>
    %203 = arith.addf %202, %200 : vector<8x128xf32>
    %204 = arith.negf %203 : vector<8x128xf32>
    %205 = math.exp %204 : vector<8x128xf32>
    %cst_41 = arith.constant 1.000000e+00 : f32
    %206 = vector.broadcast %cst_41 : f32 to vector<8x128xf32>
    %207 = arith.addf %206, %205 : vector<8x128xf32>
    %208 = arith.divf %206, %207 : vector<8x128xf32>
    %209 = math.tanh %203 : vector<8x128xf32>
    %210 = vector.extract_strided_slice %208 {offsets = [0, 0], sizes = [8, 32], strides = [1, 1]} : vector<8x128xf32> to vector<8x32xf32>
    %211 = vector.extract_strided_slice %208 {offsets = [0, 32], sizes = [8, 32], strides = [1, 1]} : vector<8x128xf32> to vector<8x32xf32>
    %212 = vector.extract_strided_slice %209 {offsets = [0, 64], sizes = [8, 32], strides = [1, 1]} : vector<8x128xf32> to vector<8x32xf32>
    %213 = vector.extract_strided_slice %208 {offsets = [0, 96], sizes = [8, 32], strides = [1, 1]} : vector<8x128xf32> to vector<8x32xf32>
    %214 = arith.mulf %211, %175 : vector<8x32xf32>
    %215 = arith.mulf %210, %212 : vector<8x32xf32>
    %216 = arith.addf %214, %215 : vector<8x32xf32>
    %217 = math.tanh %216 : vector<8x32xf32>
    %218 = arith.mulf %213, %217 : vector<8x32xf32>
    %219 = vector.extract_strided_slice %9 {offsets = [40, 0], sizes = [8, 128], strides = [1, 1]} : vector<64x128xf32> to vector<8x128xf32>
    %220 = arith.truncf %196 : vector<8x32xf32> to vector<8x32xbf16>
    %cst_42 = arith.constant dense<0.000000e+00> : vector<8x128xf32>
    %221 = tpu.matmul %220, %2, %cst_42 {dimension_numbers = #tpu.dot_dimension_numbers<[1], [0], [0], [1], [0, 0, 1, 1], [], []>} : vector<8x32xbf16>, vector<32x128xbf16>, vector<8x128xf32> -> vector<8x128xf32>
    %222 = arith.addf %221, %219 : vector<8x128xf32>
    %223 = arith.negf %222 : vector<8x128xf32>
    %224 = math.exp %223 : vector<8x128xf32>
    %cst_43 = arith.constant 1.000000e+00 : f32
    %225 = vector.broadcast %cst_43 : f32 to vector<8x128xf32>
    %226 = arith.addf %225, %224 : vector<8x128xf32>
    %227 = arith.divf %225, %226 : vector<8x128xf32>
    %228 = math.tanh %222 : vector<8x128xf32>
    %229 = vector.extract_strided_slice %227 {offsets = [0, 0], sizes = [8, 32], strides = [1, 1]} : vector<8x128xf32> to vector<8x32xf32>
    %230 = vector.extract_strided_slice %227 {offsets = [0, 32], sizes = [8, 32], strides = [1, 1]} : vector<8x128xf32> to vector<8x32xf32>
    %231 = vector.extract_strided_slice %228 {offsets = [0, 64], sizes = [8, 32], strides = [1, 1]} : vector<8x128xf32> to vector<8x32xf32>
    %232 = vector.extract_strided_slice %227 {offsets = [0, 96], sizes = [8, 32], strides = [1, 1]} : vector<8x128xf32> to vector<8x32xf32>
    %233 = arith.mulf %230, %194 : vector<8x32xf32>
    %234 = arith.mulf %229, %231 : vector<8x32xf32>
    %235 = arith.addf %233, %234 : vector<8x32xf32>
    %236 = math.tanh %235 : vector<8x32xf32>
    %237 = arith.mulf %232, %236 : vector<8x32xf32>
    %238 = arith.truncf %237 : vector<8x32xf32> to vector<8x32xbf16>
    %cst_44 = arith.constant dense<0.000000e+00> : vector<8x128xf32>
    %239 = tpu.matmul %238, %1, %cst_44 {dimension_numbers = #tpu.dot_dimension_numbers<[1], [0], [0], [1], [0, 0, 1, 1], [], []>} : vector<8x32xbf16>, vector<32x128xbf16>, vector<8x128xf32> -> vector<8x128xf32>
    %240 = vector.broadcast %5 : vector<1x128xf32> to vector<8x128xf32>
    %241 = arith.addf %239, %240 : vector<8x128xf32>
    %242 = arith.truncf %218 : vector<8x32xf32> to vector<8x32xbf16>
    %cst_45 = arith.constant dense<0.000000e+00> : vector<8x128xf32>
    %243 = tpu.matmul %242, %3, %cst_45 {dimension_numbers = #tpu.dot_dimension_numbers<[1], [0], [0], [1], [0, 0, 1, 1], [], []>} : vector<8x32xbf16>, vector<32x128xbf16>, vector<8x128xf32> -> vector<8x128xf32>
    %244 = arith.addf %243, %241 : vector<8x128xf32>
    %245 = arith.negf %244 : vector<8x128xf32>
    %246 = math.exp %245 : vector<8x128xf32>
    %cst_46 = arith.constant 1.000000e+00 : f32
    %247 = vector.broadcast %cst_46 : f32 to vector<8x128xf32>
    %248 = arith.addf %247, %246 : vector<8x128xf32>
    %249 = arith.divf %247, %248 : vector<8x128xf32>
    %250 = math.tanh %244 : vector<8x128xf32>
    %251 = vector.extract_strided_slice %249 {offsets = [0, 0], sizes = [8, 32], strides = [1, 1]} : vector<8x128xf32> to vector<8x32xf32>
    %252 = vector.extract_strided_slice %249 {offsets = [0, 32], sizes = [8, 32], strides = [1, 1]} : vector<8x128xf32> to vector<8x32xf32>
    %253 = vector.extract_strided_slice %250 {offsets = [0, 64], sizes = [8, 32], strides = [1, 1]} : vector<8x128xf32> to vector<8x32xf32>
    %254 = vector.extract_strided_slice %249 {offsets = [0, 96], sizes = [8, 32], strides = [1, 1]} : vector<8x128xf32> to vector<8x32xf32>
    %255 = arith.mulf %252, %216 : vector<8x32xf32>
    %256 = arith.mulf %251, %253 : vector<8x32xf32>
    %257 = arith.addf %255, %256 : vector<8x32xf32>
    %258 = math.tanh %257 : vector<8x32xf32>
    %259 = arith.mulf %254, %258 : vector<8x32xf32>
    %260 = vector.extract_strided_slice %9 {offsets = [48, 0], sizes = [8, 128], strides = [1, 1]} : vector<64x128xf32> to vector<8x128xf32>
    %261 = arith.truncf %237 : vector<8x32xf32> to vector<8x32xbf16>
    %cst_47 = arith.constant dense<0.000000e+00> : vector<8x128xf32>
    %262 = tpu.matmul %261, %2, %cst_47 {dimension_numbers = #tpu.dot_dimension_numbers<[1], [0], [0], [1], [0, 0, 1, 1], [], []>} : vector<8x32xbf16>, vector<32x128xbf16>, vector<8x128xf32> -> vector<8x128xf32>
    %263 = arith.addf %262, %260 : vector<8x128xf32>
    %264 = arith.negf %263 : vector<8x128xf32>
    %265 = math.exp %264 : vector<8x128xf32>
    %cst_48 = arith.constant 1.000000e+00 : f32
    %266 = vector.broadcast %cst_48 : f32 to vector<8x128xf32>
    %267 = arith.addf %266, %265 : vector<8x128xf32>
    %268 = arith.divf %266, %267 : vector<8x128xf32>
    %269 = math.tanh %263 : vector<8x128xf32>
    %270 = vector.extract_strided_slice %268 {offsets = [0, 0], sizes = [8, 32], strides = [1, 1]} : vector<8x128xf32> to vector<8x32xf32>
    %271 = vector.extract_strided_slice %268 {offsets = [0, 32], sizes = [8, 32], strides = [1, 1]} : vector<8x128xf32> to vector<8x32xf32>
    %272 = vector.extract_strided_slice %269 {offsets = [0, 64], sizes = [8, 32], strides = [1, 1]} : vector<8x128xf32> to vector<8x32xf32>
    %273 = vector.extract_strided_slice %268 {offsets = [0, 96], sizes = [8, 32], strides = [1, 1]} : vector<8x128xf32> to vector<8x32xf32>
    %274 = arith.mulf %271, %235 : vector<8x32xf32>
    %275 = arith.mulf %270, %272 : vector<8x32xf32>
    %276 = arith.addf %274, %275 : vector<8x32xf32>
    %277 = math.tanh %276 : vector<8x32xf32>
    %278 = arith.mulf %273, %277 : vector<8x32xf32>
    %279 = arith.truncf %278 : vector<8x32xf32> to vector<8x32xbf16>
    %cst_49 = arith.constant dense<0.000000e+00> : vector<8x128xf32>
    %280 = tpu.matmul %279, %1, %cst_49 {dimension_numbers = #tpu.dot_dimension_numbers<[1], [0], [0], [1], [0, 0, 1, 1], [], []>} : vector<8x32xbf16>, vector<32x128xbf16>, vector<8x128xf32> -> vector<8x128xf32>
    %281 = vector.broadcast %5 : vector<1x128xf32> to vector<8x128xf32>
    %282 = arith.addf %280, %281 : vector<8x128xf32>
    %283 = arith.truncf %259 : vector<8x32xf32> to vector<8x32xbf16>
    %cst_50 = arith.constant dense<0.000000e+00> : vector<8x128xf32>
    %284 = tpu.matmul %283, %3, %cst_50 {dimension_numbers = #tpu.dot_dimension_numbers<[1], [0], [0], [1], [0, 0, 1, 1], [], []>} : vector<8x32xbf16>, vector<32x128xbf16>, vector<8x128xf32> -> vector<8x128xf32>
    %285 = arith.addf %284, %282 : vector<8x128xf32>
    %286 = arith.negf %285 : vector<8x128xf32>
    %287 = math.exp %286 : vector<8x128xf32>
    %cst_51 = arith.constant 1.000000e+00 : f32
    %288 = vector.broadcast %cst_51 : f32 to vector<8x128xf32>
    %289 = arith.addf %288, %287 : vector<8x128xf32>
    %290 = arith.divf %288, %289 : vector<8x128xf32>
    %291 = math.tanh %285 : vector<8x128xf32>
    %292 = vector.extract_strided_slice %290 {offsets = [0, 0], sizes = [8, 32], strides = [1, 1]} : vector<8x128xf32> to vector<8x32xf32>
    %293 = vector.extract_strided_slice %290 {offsets = [0, 32], sizes = [8, 32], strides = [1, 1]} : vector<8x128xf32> to vector<8x32xf32>
    %294 = vector.extract_strided_slice %291 {offsets = [0, 64], sizes = [8, 32], strides = [1, 1]} : vector<8x128xf32> to vector<8x32xf32>
    %295 = vector.extract_strided_slice %290 {offsets = [0, 96], sizes = [8, 32], strides = [1, 1]} : vector<8x128xf32> to vector<8x32xf32>
    %296 = arith.mulf %293, %257 : vector<8x32xf32>
    %297 = arith.mulf %292, %294 : vector<8x32xf32>
    %298 = arith.addf %296, %297 : vector<8x32xf32>
    %299 = math.tanh %298 : vector<8x32xf32>
    %300 = arith.mulf %295, %299 : vector<8x32xf32>
    %301 = vector.extract_strided_slice %9 {offsets = [56, 0], sizes = [8, 128], strides = [1, 1]} : vector<64x128xf32> to vector<8x128xf32>
    %302 = arith.truncf %278 : vector<8x32xf32> to vector<8x32xbf16>
    %cst_52 = arith.constant dense<0.000000e+00> : vector<8x128xf32>
    %303 = tpu.matmul %302, %2, %cst_52 {dimension_numbers = #tpu.dot_dimension_numbers<[1], [0], [0], [1], [0, 0, 1, 1], [], []>} : vector<8x32xbf16>, vector<32x128xbf16>, vector<8x128xf32> -> vector<8x128xf32>
    %304 = arith.addf %303, %301 : vector<8x128xf32>
    %305 = arith.negf %304 : vector<8x128xf32>
    %306 = math.exp %305 : vector<8x128xf32>
    %cst_53 = arith.constant 1.000000e+00 : f32
    %307 = vector.broadcast %cst_53 : f32 to vector<8x128xf32>
    %308 = arith.addf %307, %306 : vector<8x128xf32>
    %309 = arith.divf %307, %308 : vector<8x128xf32>
    %310 = math.tanh %304 : vector<8x128xf32>
    %311 = vector.extract_strided_slice %309 {offsets = [0, 0], sizes = [8, 32], strides = [1, 1]} : vector<8x128xf32> to vector<8x32xf32>
    %312 = vector.extract_strided_slice %309 {offsets = [0, 32], sizes = [8, 32], strides = [1, 1]} : vector<8x128xf32> to vector<8x32xf32>
    %313 = vector.extract_strided_slice %310 {offsets = [0, 64], sizes = [8, 32], strides = [1, 1]} : vector<8x128xf32> to vector<8x32xf32>
    %314 = vector.extract_strided_slice %309 {offsets = [0, 96], sizes = [8, 32], strides = [1, 1]} : vector<8x128xf32> to vector<8x32xf32>
    %315 = arith.mulf %312, %276 : vector<8x32xf32>
    %316 = arith.mulf %311, %313 : vector<8x32xf32>
    %317 = arith.addf %315, %316 : vector<8x32xf32>
    %318 = math.tanh %317 : vector<8x32xf32>
    %319 = arith.mulf %314, %318 : vector<8x32xf32>
    %320 = arith.truncf %319 : vector<8x32xf32> to vector<8x32xbf16>
    %cst_54 = arith.constant dense<0.000000e+00> : vector<8x128xf32>
    %321 = tpu.matmul %320, %1, %cst_54 {dimension_numbers = #tpu.dot_dimension_numbers<[1], [0], [0], [1], [0, 0, 1, 1], [], []>} : vector<8x32xbf16>, vector<32x128xbf16>, vector<8x128xf32> -> vector<8x128xf32>
    %322 = vector.broadcast %5 : vector<1x128xf32> to vector<8x128xf32>
    %323 = arith.addf %321, %322 : vector<8x128xf32>
    %324 = arith.truncf %300 : vector<8x32xf32> to vector<8x32xbf16>
    %cst_55 = arith.constant dense<0.000000e+00> : vector<8x128xf32>
    %325 = tpu.matmul %324, %3, %cst_55 {dimension_numbers = #tpu.dot_dimension_numbers<[1], [0], [0], [1], [0, 0, 1, 1], [], []>} : vector<8x32xbf16>, vector<32x128xbf16>, vector<8x128xf32> -> vector<8x128xf32>
    %326 = arith.addf %325, %323 : vector<8x128xf32>
    %327 = arith.negf %326 : vector<8x128xf32>
    %328 = math.exp %327 : vector<8x128xf32>
    %cst_56 = arith.constant 1.000000e+00 : f32
    %329 = vector.broadcast %cst_56 : f32 to vector<8x128xf32>
    %330 = arith.addf %329, %328 : vector<8x128xf32>
    %331 = arith.divf %329, %330 : vector<8x128xf32>
    %332 = math.tanh %326 : vector<8x128xf32>
    %333 = vector.extract_strided_slice %331 {offsets = [0, 0], sizes = [8, 32], strides = [1, 1]} : vector<8x128xf32> to vector<8x32xf32>
    %334 = vector.extract_strided_slice %331 {offsets = [0, 32], sizes = [8, 32], strides = [1, 1]} : vector<8x128xf32> to vector<8x32xf32>
    %335 = vector.extract_strided_slice %332 {offsets = [0, 64], sizes = [8, 32], strides = [1, 1]} : vector<8x128xf32> to vector<8x32xf32>
    %336 = vector.extract_strided_slice %331 {offsets = [0, 96], sizes = [8, 32], strides = [1, 1]} : vector<8x128xf32> to vector<8x32xf32>
    %337 = arith.mulf %334, %298 : vector<8x32xf32>
    %338 = arith.mulf %333, %335 : vector<8x32xf32>
    %339 = arith.addf %337, %338 : vector<8x32xf32>
    %340 = math.tanh %339 : vector<8x32xf32>
    %341 = arith.mulf %336, %340 : vector<8x32xf32>
    %c0_57 = arith.constant 0 : index
    %c0_58 = arith.constant 0 : index
    %342 = vector.load %arg7[%c0_57, %c0_58] : memref<1x32xf32, #tpu.memory_space<vmem>>, vector<1x32xf32>
    %343 = vector.broadcast %342 : vector<1x32xf32> to vector<8x32xf32>
    %344 = arith.mulf %341, %343 : vector<8x32xf32>
    %cst_59 = arith.constant dense<0.000000e+00> : vector<8xf32>
    %345 = vector.multi_reduction <add>, %344, %cst_59 [1] : vector<8x32xf32> to vector<8xf32>
    %346 = vector.shape_cast %345 : vector<8xf32> to vector<8x1xf32>
    %c0_60 = arith.constant 0 : index
    %c0_61 = arith.constant 0 : index
    %347 = vector.load %arg8[%c0_60, %c0_61] : memref<1x1xf32, #tpu.memory_space<vmem>>, vector<1x1xf32>
    %348 = vector.broadcast %347 : vector<1x1xf32> to vector<8x1xf32>
    %349 = arith.addf %346, %348 : vector<8x1xf32>
    %c0_62 = arith.constant 0 : index
    %c0_63 = arith.constant 0 : index
    %350 = vector.load %arg9[%c0_62, %c0_63] : memref<8x1xf32, #tpu.memory_space<vmem>>, vector<8x1xf32>
    tpu.vector_store %arg9[%c0_62, %c0_63], %349 {strides = array<i32>} : memref<8x1xf32, #tpu.memory_space<vmem>>, vector<8x1xf32>,
    return
  }
}

</mosaic_0001>

<bundles_post_ra>
// kernel: tpu_custom_call.1
= control target key start
LH: loop header
LB: loop body
LE: loop exit
PB: predicated region body
PF: predicated region fallthrough
CT: control target
= control target key end

     0   :  { %s1824_s0 = inlined_call_operand.vmem [shape: bf16[64,8], index: 0, kind: input, shape index: {}]   ;;  %s1825_s1 = inlined_call_operand.vmem [shape: bf16[8,128], index: 1, kind: input, shape index: {}]   ;;  %s1826_s2 = inlined_call_operand.vmem [shape: bf16[32,128], index: 2, kind: input, shape index: {}]   ;;  %s1827_s3 = inlined_call_operand.vmem [shape: f32[1,128], index: 3, kind: input, shape index: {}]   ;;  %s1828_s4 = inlined_call_operand.vmem [shape: bf16[32,128], index: 4, kind: input, shape index: {}]   ;;  %s1829_s5 = inlined_call_operand.hbm [shape: bf16[32,128], index: 5, kind: input, shape index: {}]   ;;  %s1830_s6 = inlined_call_operand.vmem [shape: f32[1,128], index: 6, kind: input, shape index: {}]   ;;  %s1831_s7 = inlined_call_operand.vmem [shape: f32[1,32], index: 7, kind: input, shape index: {}]   ;;  %s1832_s8 = inlined_call_operand.<no memory space> [shape: f32[1,1], index: 8, kind: input, shape index: {}]   ;;  %s1833_s9 = inlined_call_operand.vmem [shape: f32[8,1], index: 9, kind: output, shape index: {}]  }
   0x1   :  { %v14_v0 = vstv %s1832_s8 }
   0x2   :  { %15 = vst [vmem:[#allocation2] sm:$0x1] %v14_v0 }
   0x3   :  { %16 = vsyncpa [#allocation4], 0  ;;  %s31_s13 = sshll.u32 %s1829_s5, 4  ;;  %s1479_s14 = smov [#allocation3]   ;;  %s32_s13 = int_to_ptr.hbm [resolvable:$true] %s31_s13 }
   0x4   :  { %s33_s15 = sshll.u32 %s1479_s14, 4  ;;  %s1480_s16 = smov 64   ;;  %s34_s15 = int_to_ptr.vmem [resolvable:$true] %s33_s15 }
   0x5   :  { %s1481_s17 = smov 4  }
   0x6   :  { %39 = dma.hbm_to_vmem [thread:$0]  %s32_s13, 256, %s34_s15, [#allocation4], %s1480_s16, %s1480_s16, %s1481_s17  }
   0x7   :  { %1477 = dma.done.wait [#allocation4], 256  }
   0x8   :  { %1478 = vsyncadd [#allocation4], 4294967040  ;;  %vm110_vm0 = vcmask 1043456   ;;  %v51_v1 = vld [vmem:[%s1825_s1] sm:$0xf]  ;;  %v1549_v2 = vld [vmem:[%s1826_s2 + $0x8] sm:$0xff] }
   0x9   :  { %v112_v3 = vsel %vm110_vm0, %v51_v1, 0  ;;  %v1309_v4 = vld [vmem:[%s1824_s0] sm:$0xff]  ;;  %vm97_vm1 = vcmask 64512   ;;  %165 = vmatpush.bf16.msra.mxu1 %v1549_v2  ;;  %v1482_v6 = vmov 0   ;;  %s1483_s24 = smov 32   ;;  %v1580_v33 = vld [vmem:[#allocation3 + $0x8] sm:$0xff] }
   0xa   :  { %v1557_v5 = vld [vmem:[%s1826_s2] sm:$0xff]  ;;  %121 = vmatpush.bf16.msra.mxu0 %v112_v3  ;;  %v1585_v34 = vld [vmem:[%s1828_s4 + $0x8] sm:$0xff]  ;;  %262 = vmatpush.bf16.msra.mxu3 %v1580_v33  ;;  %vm155_vm6 = vcmask 261120   ;;  %s1484_s8 = smov 96  }
   0xb   :  { %v1571_v7 = vld [vmem:[%s1827_s3] ss:$0 sm:$0xff]  ;;  %v1588_v35 = vld [vmem:[#allocation3] sm:$0xff]  ;;  %237 = vmatpush.bf16.msra.mxu2 %v1585_v34 }
   0xc   :  { %v1594_v36 = vld [vmem:[%s1828_s4] sm:$0xff] }
   0xd   :  { %1237 = vmatmul.msk.bf16.vlgmr.msra.gmra.mxu0 %vm97_vm1, %v1309_v4  ;;  %166 = vmatpush.bf16.msra.mxu1 %v1557_v5  ;;  %v1617_v47 = vld [vmem:[%s1830_s6] ss:$0 sm:$0xff] }
   0xe   :  { %693 = vmatpush.bf16.msrb.mxu0 %v1549_v2  ;;  %263 = vmatpush.bf16.msra.mxu3 %v1588_v35 }
   0xf   :  { %238 = vmatpush.bf16.msra.mxu2 %v1594_v36 }
  0x10   :  { %167 = vmatmul.bf16.vlgmr.msra.gmra.mxu1 %v1482_v6 }
  0x11   :  { %312 = vmatpush.bf16.msrb.mxu1 %v1549_v2  ;;  %264 = vmatmul.bf16.vlgmr.msra.gmra.mxu3 %v1482_v6 }
  0x12   :  { %694 = vmatpush.bf16.msrb.mxu0 %v1557_v5  ;;  %389 = vmatpush.bf16.msrb.mxu3 %v1580_v33 }
  0x13   :  { %369 = vmatpush.bf16.msrb.mxu2 %v1585_v34 }
  0x15   :  { %313 = vmatpush.bf16.msrb.mxu1 %v1557_v5 }
  0x16   :  { %877 = vmatpush.bf16.msra.mxu0 %v1585_v34  ;;  %390 = vmatpush.bf16.msrb.mxu3 %v1588_v35 }
  0x17   :  { %370 = vmatpush.bf16.msrb.mxu2 %v1594_v36 }
  0x19   :  { %439 = vmatpush.bf16.msra.mxu1 %v1549_v2 }
  0x1a   :  { %878 = vmatpush.bf16.msra.mxu0 %v1594_v36  ;;  %516 = vmatpush.bf16.msra.mxu3 %v1580_v33 }
  0x1d   :  { %440 = vmatpush.bf16.msra.mxu1 %v1557_v5 }
  0x1e   :  { %517 = vmatpush.bf16.msra.mxu3 %v1588_v35 }
  0x8a   :  { %v123_v8 = vpop.f32.mrf.mxu0 }
  0x8b   :  { %v124_v9 = vadd.f32 %v1571_v7, %v123_v8 }
  0x8d   :  { %v168_v10 = vpop.f32.mrf.mxu1 }
  0x8e   :  { %v169_v11 = vadd.f32 %v168_v10, %v124_v9 }
  0x90   :  { %1323 = vtanh.f32 %v169_v11  ;;  %v1249_v14 = vmul.f32 -1.442695, %v169_v11 }
  0x92   :  { %1325 = vpow2.f32 %v1249_v14  ;;  %v125_v43 = vpop.f32.mrf.mxu0 }
  0x93   :  { %v126_v44 = vadd.f32 %v1571_v7, %v125_v43 }
  0x94   :  { %v265_v40 = vpop.f32.mrf.mxu3 }
  0x95   :  { %v170_v12 = vpop.f32.mrf.mxu1 }
  0x96   :  { %v1324_v13 = vpop.eup %1323 }
  0x97   :  { %194 = vrot.lane.b32.xlu0 %v1324_v13, %s1480_s16 }
  0x98   :  { %v1326_v15 = vpop.eup %1325 }
  0x99   :  { %v175_v16 = vadd.f32 1.0, %v1326_v15 }
  0x9b   :  { %1327 = vrcp.f32 %v175_v16  ;;  %v187_v22 = vand.u32 2147483648, %v175_v16  ;;  %vm181_vm3 = vweird.f32 %v175_v16  ;;  %v185_v23 = vand.u32 2147483647, %v175_v16 }
  0x9c   :  { %v267_v42 = vpop.f32.mrf.mxu3 }
  0x9d   :  { %v188_v25 = vor.u32 1.1754944e-38, %v187_v22  ;;  %vm186_vm5 = vcmp.eq.f32.partialorder %v185_v23, 8.507059e+37 }
  0xa1   :  { %v1328_v17 = vpop.eup %1327 }
  0xa2   :  { %v177_v18 = vmul.f32 %v1328_v17, %v175_v16  ;;  %vm182_vm2 = vweird.f32 %v1328_v17 }
  0xa3   :  { %vm183_vm4 = vmor %vm181_vm3, %vm182_vm2 }
  0xa4   :  { %v178_v19 = vsub.f32 1.0, %v177_v18 }
  0xa6   :  { %v179_v20 = vmul.f32 %v1328_v17, %v178_v19 }
  0xa8   :  { %v180_v21 = vadd.f32 %v1328_v17, %v179_v20 }
  0xaa   :  { %v184_v24 = vsel %vm183_vm4, %v1328_v17, %v180_v21 }
  0xab   :  { %v189_v27 = vsel %vm186_vm5, %v188_v25, %v184_v24 }
  0xac   :  { %v192_v29 = vmul.f32 0.0, %v189_v27 }
 0x109   :  { %v195_v26 = vpop.permute.xlu0 %194 }
 0x10a   :  { %v197_v28 = vmul.f32 %v195_v26, %v189_v27 }
 0x10c   :  { %199 = vrot.lane.b32.xlu0 %v197_v28, %s1483_s24 }
 0x17e   :  { %v200_v30 = vpop.permute.xlu0 %199 }
 0x17f   :  { %v1576_v31 = vadd.f32 %v200_v30, %v192_v29 }
 0x181   :  { %1329 = vtanh.f32 %v1576_v31 }
 0x187   :  { %v1330_v32 = vpop.eup %1329 }
 0x188   :  { %205 = vrot.lane.b32.xlu1 %v1330_v32, %s1480_s16 }
 0x1fa   :  { %v206_v37 = vpop.permute.xlu1 %205 }
 0x1fb   :  { %v208_v38 = vmul.f32 %v206_v37, %v189_v27 }
 0x1fd   :  { %v209_v39 = vpack.c.bf16 %v208_v38, %v208_v38 }
 0x1ff   :  { %214 = vrot.lane.b32.xlu1 %v209_v39, %s1483_s24  ;;  %v1310_v39 = vld [vmem:[%s1824_s0 + $0x8] sm:$0xff] }
 0x200   :  { %1238 = vmatmul.msk.bf16.gmra.mxu0 %vm97_vm1, %v1310_v39 }
 0x271   :  { %v215_v41 = vpop.permute.xlu1 %214 }
 0x272   :  { %1258 = vmatmul.msk.bf16.vlgmr.msra.gmra.mxu2 %vm155_vm6, %v215_v41  ;;  %1268 = vmatmul.msk.bf16.vlgmr.msrb.gmra.mxu1 %vm155_vm6, %v215_v41 }
 0x273   :  { %496 = vmatpush.bf16.msra.mxu2 %v1585_v34  ;;  %566 = vmatpush.bf16.msrb.mxu1 %v1549_v2 }
 0x277   :  { %497 = vmatpush.bf16.msra.mxu2 %v1594_v36  ;;  %567 = vmatpush.bf16.msrb.mxu1 %v1557_v5 }
 0x2ef   :  { %v315_v45 = vpop.f32.mrf.mxu1 }
 0x2f0   :  { %v316_v46 = vadd.f32 %v315_v45, %v126_v44  ;;  %v128_v45 = vpop.f32.mrf.mxu0 }
 0x2f2   :  { %1331 = vtanh.f32 %v316_v46  ;;  %v1269_v55 = vmul.f32 -1.442695, %v316_v46  ;;  %v129_v46 = vadd.f32 %v1571_v7, %v128_v45 }
 0x2f5   :  { %v240_v48 = vpop.f32.mrf.mxu2 }
 0x2f6   :  { %v241_v49 = vadd.f32 %v1617_v47, %v240_v48 }
 0x2f7   :  { %v317_v50 = vpop.f32.mrf.mxu1 }
 0x2f8   :  { %v1332_v51 = vpop.eup %1331  ;;  %v266_v52 = vadd.f32 %v265_v40, %v241_v49 }
 0x2f9   :  { %341 = vrot.lane.b32.xlu2 %v1332_v51, %s1480_s16 }
 0x2fa   :  { %1333 = vtanh.f32 %v266_v52  ;;  %v1267_v56 = vmul.f32 -1.442695, %v266_v52 }
 0x2fb   :  { %1335 = vpow2.f32 %v1269_v55 }
 0x2fc   :  { %1337 = vpow2.f32 %v1267_v56 }
 0x2fd   :  { %v242_v53 = vpop.f32.mrf.mxu2 }
 0x300   :  { %v1334_v54 = vpop.eup %1333 }
 0x301   :  { %291 = vrot.lane.b32.xlu2 %v1334_v54, %s1480_s16  ;;  %v1336_v57 = vpop.eup %1335 }
 0x302   :  { %v322_v58 = vadd.f32 1.0, %v1336_v57  ;;  %v1338_v59 = vpop.eup %1337 }
 0x303   :  { %v272_v60 = vadd.f32 1.0, %v1338_v59 }
 0x304   :  { %1339 = vrcp.f32 %v322_v58  ;;  %v334_v8 = vand.u32 2147483648, %v322_v58  ;;  %vm328_vm8 = vweird.f32 %v322_v58  ;;  %v332_v9 = vand.u32 2147483647, %v322_v58 }
 0x305   :  { %1341 = vrcp.f32 %v272_v60  ;;  %v284_v17 = vand.u32 2147483648, %v272_v60  ;;  %vm278_vm12 = vweird.f32 %v272_v60  ;;  %v282_v18 = vand.u32 2147483647, %v272_v60 }
 0x306   :  { %v335_v12 = vor.u32 1.1754944e-38, %v334_v8  ;;  %vm333_vm10 = vcmp.eq.f32.partialorder %v332_v9, 8.507059e+37 }
 0x307   :  { %v285_v20 = vor.u32 1.1754944e-38, %v284_v17  ;;  %vm283_vm14 = vcmp.eq.f32.partialorder %v282_v18, 8.507059e+37 }
 0x30a   :  { %v1340_v61 = vpop.eup %1339 }
 0x30b   :  { %v324_v62 = vmul.f32 %v1340_v61, %v322_v58  ;;  %v1342_v0 = vpop.eup %1341  ;;  %vm329_vm7 = vweird.f32 %v1340_v61 }
 0x30c   :  { %v274_v3 = vmul.f32 %v1342_v0, %v272_v60  ;;  %vm330_vm9 = vmor %vm328_vm8, %vm329_vm7  ;;  %vm279_vm11 = vweird.f32 %v1342_v0 }
 0x30d   :  { %v325_v63 = vsub.f32 1.0, %v324_v62  ;;  %vm280_vm13 = vmor %vm278_vm12, %vm279_vm11 }
 0x30e   :  { %v275_v6 = vsub.f32 1.0, %v274_v3 }
 0x30f   :  { %v326_v1 = vmul.f32 %v1340_v61, %v325_v63 }
 0x310   :  { %v276_v11 = vmul.f32 %v1342_v0, %v275_v6 }
 0x311   :  { %v327_v4 = vadd.f32 %v1340_v61, %v326_v1 }
 0x312   :  { %v277_v16 = vadd.f32 %v1342_v0, %v276_v11 }
 0x313   :  { %v331_v10 = vsel %vm330_vm9, %v1340_v61, %v327_v4 }
 0x314   :  { %v336_v14 = vsel %vm333_vm10, %v335_v12, %v331_v10  ;;  %v281_v19 = vsel %vm280_vm13, %v1342_v0, %v277_v16 }
 0x315   :  { %v286_v22 = vsel %vm283_vm14, %v285_v20, %v281_v19  ;;  %v339_v24 = vmul.f32 %v336_v14, %v1576_v31 }
 0x316   :  { %v289_v27 = vmul.f32 0.0, %v286_v22 }
 0x353   :  { %v342_v13 = vpop.permute.xlu2 %341 }
 0x354   :  { %v344_v15 = vmul.f32 %v342_v13, %v336_v14 }
 0x356   :  { %346 = vrot.lane.b32.xlu0 %v344_v15, %s1483_s24 }
 0x35b   :  { %v292_v21 = vpop.permute.xlu2 %291 }
 0x35c   :  { %v294_v23 = vmul.f32 %v292_v21, %v286_v22 }
 0x35e   :  { %296 = vrot.lane.b32.xlu1 %v294_v23, %s1483_s24 }
 0x3c8   :  { %v347_v25 = vpop.permute.xlu0 %346 }
 0x3c9   :  { %v1625_v26 = vadd.f32 %v347_v25, %v339_v24 }
 0x3cb   :  { %1343 = vtanh.f32 %v1625_v26 }
 0x3d0   :  { %v297_v28 = vpop.permute.xlu1 %296 }
 0x3d1   :  { %v1344_v29 = vpop.eup %1343  ;;  %v1628_v30 = vadd.f32 %v297_v28, %v289_v27 }
 0x3d2   :  { %352 = vrot.lane.b32.xlu2 %v1344_v29, %s1480_s16 }
 0x3d3   :  { %1345 = vtanh.f32 %v1628_v30 }
 0x3d9   :  { %v1346_v32 = vpop.eup %1345 }
 0x3da   :  { %302 = vrot.lane.b32.xlu0 %v1346_v32, %s1480_s16 }
 0x42c   :  { %v353_v37 = vpop.permute.xlu2 %352 }
 0x42d   :  { %v355_v38 = vmul.f32 %v353_v37, %v336_v14 }
 0x42f   :  { %v356_v31 = vpack.c.bf16 %v355_v38, %v355_v38 }
 0x431   :  { %358 = vrot.lane.b32.xlu1 %v356_v31, %s1483_s24 }
 0x44c   :  { %v303_v40 = vpop.permute.xlu0 %302 }
 0x44d   :  { %v305_v41 = vmul.f32 %v303_v40, %v286_v22 }
 0x44f   :  { %v376_v42 = vpack.c.bf16 %v305_v41, %v305_v41 }
 0x451   :  { %378 = vrot.lane.b32.xlu2 %v376_v42, %s1483_s24 }
 0x4a3   :  { %v359_v43 = vpop.permute.xlu1 %358 }
 0x4a4   :  { %1270 = vmatmul.msk.bf16.vlgmr.msrb.gmra.mxu2 %vm155_vm6, %v359_v43  ;;  %1273 = vmatmul.msk.bf16.vlgmr.msra.gmra.mxu1 %vm155_vm6, %v359_v43 }
 0x4a5   :  { %623 = vmatpush.bf16.msrb.mxu2 %v1585_v34  ;;  %750 = vmatpush.bf16.msra.mxu1 %v1585_v34 }
 0x4a9   :  { %624 = vmatpush.bf16.msrb.mxu2 %v1594_v36  ;;  %751 = vmatpush.bf16.msra.mxu1 %v1594_v36 }
 0x4ab   :  { %v379_v44 = vpop.permute.xlu2 %378 }
 0x4ac   :  { %1271 = vmatmul.msk.bf16.vlgmr.msrb.gmra.mxu3 %vm155_vm6, %v379_v44 }
 0x4ad   :  { %643 = vmatpush.bf16.msrb.mxu3 %v1580_v33 }
 0x4b1   :  { %644 = vmatpush.bf16.msrb.mxu3 %v1588_v35 }
 0x521   :  { %v442_v48 = vpop.f32.mrf.mxu1 }
 0x522   :  { %v443_v49 = vadd.f32 %v442_v48, %v129_v46 }
 0x524   :  { %1347 = vtanh.f32 %v443_v49  ;;  %v1274_v59 = vmul.f32 -1.442695, %v443_v49  ;;  %v130_v49 = vpop.f32.mrf.mxu0 }
 0x527   :  { %v372_v50 = vpop.f32.mrf.mxu2 }
 0x528   :  { %v373_v53 = vadd.f32 %v1617_v47, %v372_v50  ;;  %v131_v50 = vadd.f32 %v1571_v7, %v130_v49 }
 0x529   :  { %v444_v51 = vpop.f32.mrf.mxu1 }
 0x52a   :  { %v1348_v52 = vpop.eup %1347 }
 0x52b   :  { %468 = vrot.lane.b32.xlu0 %v1348_v52, %s1480_s16 }
 0x52f   :  { %v374_v54 = vpop.f32.mrf.mxu2  ;;  %v392_v55 = vpop.f32.mrf.mxu3 }
 0x530   :  { %v393_v56 = vadd.f32 %v392_v55, %v373_v53 }
 0x532   :  { %1349 = vtanh.f32 %v393_v56  ;;  %v1272_v62 = vmul.f32 -1.442695, %v393_v56 }
 0x533   :  { %1351 = vpow2.f32 %v1274_v59 }
 0x537   :  { %v394_v57 = vpop.f32.mrf.mxu3 }
 0x538   :  { %v1350_v58 = vpop.eup %1349 }
 0x539   :  { %418 = vrot.lane.b32.xlu1 %v1350_v58, %s1480_s16  ;;  %v1352_v60 = vpop.eup %1351 }
 0x53a   :  { %v449_v61 = vadd.f32 1.0, %v1352_v60 }
 0x53c   :  { %1353 = vrcp.f32 %v449_v61  ;;  %v461_v10 = vand.u32 2147483648, %v449_v61  ;;  %vm455_vm0 = vweird.f32 %v449_v61  ;;  %v459_v11 = vand.u32 2147483647, %v449_v61 }
 0x53d   :  { %1355 = vpow2.f32 %v1272_v62 }
 0x53e   :  { %v462_v14 = vor.u32 1.1754944e-38, %v461_v10  ;;  %vm460_vm3 = vcmp.eq.f32.partialorder %v459_v11, 8.507059e+37 }
 0x542   :  { %v1354_v63 = vpop.eup %1353 }
 0x543   :  { %v1356_v0 = vpop.eup %1355  ;;  %v451_v1 = vmul.f32 %v1354_v63, %v449_v61  ;;  %vm456_vm15 = vweird.f32 %v1354_v63 }
 0x544   :  { %v399_v3 = vadd.f32 1.0, %v1356_v0  ;;  %vm457_vm2 = vmor %vm455_vm0, %vm456_vm15 }
 0x545   :  { %v452_v4 = vsub.f32 1.0, %v451_v1 }
 0x546   :  { %1357 = vrcp.f32 %v399_v3  ;;  %v411_v21 = vand.u32 2147483648, %v399_v3  ;;  %vm405_vm5 = vweird.f32 %v399_v3  ;;  %v409_v22 = vand.u32 2147483647, %v399_v3 }
 0x547   :  { %v453_v6 = vmul.f32 %v1354_v63, %v452_v4 }
 0x548   :  { %v412_v24 = vor.u32 1.1754944e-38, %v411_v21  ;;  %vm410_vm8 = vcmp.eq.f32.partialorder %v409_v22, 8.507059e+37 }
 0x549   :  { %v454_v9 = vadd.f32 %v1354_v63, %v453_v6 }
 0x54b   :  { %v458_v13 = vsel %vm457_vm2, %v1354_v63, %v454_v9 }
 0x54c   :  { %v1358_v8 = vpop.eup %1357  ;;  %v463_v16 = vsel %vm460_vm3, %v462_v14, %v458_v13 }
 0x54d   :  { %v401_v12 = vmul.f32 %v1358_v8, %v399_v3  ;;  %vm406_vm4 = vweird.f32 %v1358_v8  ;;  %v466_v29 = vmul.f32 %v463_v16, %v1625_v26 }
 0x54e   :  { %vm407_vm7 = vmor %vm405_vm5, %vm406_vm4 }
 0x54f   :  { %v402_v15 = vsub.f32 1.0, %v401_v12 }
 0x551   :  { %v403_v19 = vmul.f32 %v1358_v8, %v402_v15 }
 0x553   :  { %v404_v20 = vadd.f32 %v1358_v8, %v403_v19 }
 0x555   :  { %v408_v23 = vsel %vm407_vm7, %v1358_v8, %v404_v20 }
 0x556   :  { %v413_v27 = vsel %vm410_vm8, %v412_v24, %v408_v23 }
 0x557   :  { %v416_v31 = vmul.f32 %v413_v27, %v1628_v30 }
 0x59d   :  { %v469_v17 = vpop.permute.xlu0 %468 }
 0x59e   :  { %v471_v18 = vmul.f32 %v469_v17, %v463_v16 }
 0x5a0   :  { %473 = vrot.lane.b32.xlu2 %v471_v18, %s1483_s24 }
 0x5ab   :  { %v419_v25 = vpop.permute.xlu1 %418 }
 0x5ac   :  { %v421_v28 = vmul.f32 %v419_v25, %v413_v27 }
 0x5ae   :  { %423 = vrot.lane.b32.xlu0 %v421_v28, %s1483_s24 }
 0x5fa   :  { %v474_v32 = vpop.permute.xlu2 %473 }
 0x5fb   :  { %v1655_v37 = vadd.f32 %v474_v32, %v466_v29 }
 0x5fd   :  { %1359 = vtanh.f32 %v1655_v37 }
 0x603   :  { %v1360_v38 = vpop.eup %1359 }
 0x604   :  { %479 = vrot.lane.b32.xlu1 %v1360_v38, %s1480_s16 }
 0x620   :  { %v424_v39 = vpop.permute.xlu0 %423 }
 0x621   :  { %v1660_v40 = vadd.f32 %v424_v39, %v416_v31 }
 0x623   :  { %1361 = vtanh.f32 %v1660_v40 }
 0x629   :  { %v1362_v41 = vpop.eup %1361 }
 0x62a   :  { %429 = vrot.lane.b32.xlu2 %v1362_v41, %s1480_s16 }
 0x676   :  { %v480_v42 = vpop.permute.xlu1 %479 }
 0x677   :  { %v482_v26 = vmul.f32 %v480_v42, %v463_v16 }
 0x679   :  { %v483_v43 = vpack.c.bf16 %v482_v26, %v482_v26 }
 0x67b   :  { %485 = vrot.lane.b32.xlu0 %v483_v43, %s1483_s24 }
 0x684   :  { %v430_v44 = vpop.permute.xlu2 %429 }
 0x685   :  { %v432_v45 = vmul.f32 %v430_v44, %v413_v27 }
 0x687   :  { %v503_v46 = vpack.c.bf16 %v432_v45, %v432_v45 }
 0x689   :  { %505 = vrot.lane.b32.xlu1 %v503_v46, %s1483_s24 }
 0x6ed   :  { %v486_v48 = vpop.permute.xlu0 %485 }
 0x6ee   :  { %1275 = vmatmul.msk.bf16.vlgmr.msra.gmra.mxu2 %vm155_vm6, %v486_v48  ;;  %1278 = vmatmul.msk.bf16.vlgmr.msrb.gmra.mxu1 %vm155_vm6, %v486_v48 }
 0x6ef   :  { %770 = vmatpush.bf16.msra.mxu2 %v1580_v33  ;;  %897 = vmatpush.bf16.msrb.mxu1 %v1580_v33 }
 0x6f3   :  { %771 = vmatpush.bf16.msra.mxu2 %v1588_v35  ;;  %898 = vmatpush.bf16.msrb.mxu1 %v1588_v35 }
 0x6fb   :  { %v506_v30 = vpop.permute.xlu1 %505 }
 0x6fc   :  { %1276 = vmatmul.msk.bf16.vlgmr.msra.gmra.mxu3 %vm155_vm6, %v506_v30 }
 0x6fd   :  { %820 = vmatpush.bf16.msra.mxu3 %v1549_v2 }
 0x701   :  { %821 = vmatpush.bf16.msra.mxu3 %v1557_v5 }
 0x76b   :  { %v569_v51 = vpop.f32.mrf.mxu1 }
 0x76c   :  { %v570_v52 = vadd.f32 %v569_v51, %v131_v50 }
 0x76e   :  { %1363 = vtanh.f32 %v570_v52  ;;  %v1279_v62 = vmul.f32 -1.442695, %v570_v52 }
 0x771   :  { %v499_v53 = vpop.f32.mrf.mxu2 }
 0x772   :  { %v500_v57 = vadd.f32 %v1617_v47, %v499_v53 }
 0x773   :  { %v571_v54 = vpop.f32.mrf.mxu1 }
 0x774   :  { %v1364_v55 = vpop.eup %1363 }
 0x775   :  { %595 = vrot.lane.b32.xlu2 %v1364_v55, %s1480_s16 }
 0x779   :  { %v501_v56 = vpop.f32.mrf.mxu2 }
 0x77f   :  { %v519_v58 = vpop.f32.mrf.mxu3 }
 0x780   :  { %v520_v59 = vadd.f32 %v519_v58, %v500_v57 }
 0x782   :  { %1365 = vtanh.f32 %v520_v59  ;;  %v1277_v13 = vmul.f32 -1.442695, %v520_v59 }
 0x783   :  { %1367 = vpow2.f32 %v1279_v62 }
 0x787   :  { %v521_v60 = vpop.f32.mrf.mxu3 }
 0x788   :  { %v1366_v61 = vpop.eup %1365 }
 0x789   :  { %545 = vrot.lane.b32.xlu0 %v1366_v61, %s1480_s16  ;;  %v1368_v63 = vpop.eup %1367 }
 0x78a   :  { %v576_v0 = vadd.f32 1.0, %v1368_v63 }
 0x78c   :  { %1369 = vrcp.f32 %v576_v0  ;;  %v588_v9 = vand.u32 2147483648, %v576_v0  ;;  %vm582_vm10 = vweird.f32 %v576_v0  ;;  %v586_v10 = vand.u32 2147483647, %v576_v0 }
 0x78d   :  { %1371 = vpow2.f32 %v1277_v13 }
 0x78e   :  { %v589_v12 = vor.u32 1.1754944e-38, %v588_v9  ;;  %vm587_vm12 = vcmp.eq.f32.partialorder %v586_v10, 8.507059e+37 }
 0x792   :  { %v1370_v1 = vpop.eup %1369 }
 0x793   :  { %v578_v3 = vmul.f32 %v1370_v1, %v576_v0  ;;  %vm583_vm9 = vweird.f32 %v1370_v1  ;;  %v1372_v17 = vpop.eup %1371 }
 0x794   :  { %vm584_vm11 = vmor %vm582_vm10, %vm583_vm9  ;;  %v526_v18 = vadd.f32 1.0, %v1372_v17 }
 0x795   :  { %v579_v4 = vsub.f32 1.0, %v578_v3 }
 0x796   :  { %1373 = vrcp.f32 %v526_v18  ;;  %v538_v24 = vand.u32 2147483648, %v526_v18  ;;  %vm532_vm14 = vweird.f32 %v526_v18  ;;  %v536_v25 = vand.u32 2147483647, %v526_v18 }
 0x797   :  { %v580_v6 = vmul.f32 %v1370_v1, %v579_v4 }
 0x798   :  { %v539_v28 = vor.u32 1.1754944e-38, %v538_v24  ;;  %vm537_vm0 = vcmp.eq.f32.partialorder %v536_v25, 8.507059e+37 }
 0x799   :  { %v581_v8 = vadd.f32 %v1370_v1, %v580_v6 }
 0x79b   :  { %v585_v11 = vsel %vm584_vm11, %v1370_v1, %v581_v8 }
 0x79c   :  { %v590_v15 = vsel %vm587_vm12, %v589_v12, %v585_v11  ;;  %v1374_v19 = vpop.eup %1373 }
 0x79d   :  { %v528_v20 = vmul.f32 %v1374_v19, %v526_v18  ;;  %vm533_vm13 = vweird.f32 %v1374_v19  ;;  %v593_v31 = vmul.f32 %v590_v15, %v1655_v37  ;;  %v1311_v37 = vld [vmem:[%s1824_s0 + $0x10] sm:$0xff] }
 0x79e   :  { %vm534_vm15 = vmor %vm532_vm14, %vm533_vm13  ;;  %1239 = vmatmul.msk.bf16.gmra.mxu0 %vm97_vm1, %v1311_v37 }
 0x79f   :  { %v529_v21 = vsub.f32 1.0, %v528_v20 }
 0x7a1   :  { %v530_v22 = vmul.f32 %v1374_v19, %v529_v21 }
 0x7a3   :  { %v531_v23 = vadd.f32 %v1374_v19, %v530_v22 }
 0x7a5   :  { %v535_v27 = vsel %vm534_vm15, %v1374_v19, %v531_v23 }
 0x7a6   :  { %v540_v32 = vsel %vm537_vm0, %v539_v28, %v535_v27 }
 0x7a7   :  { %v543_v26 = vmul.f32 %v540_v32, %v1660_v40  ;;  %v1312_v40 = vld [vmem:[%s1824_s0 + $0x18] sm:$0xff] }
 0x7ae   :  { %1240 = vmatmul.msk.bf16.gmra.mxu0 %vm97_vm1, %v1312_v40 }
 0x7cf   :  { %v596_v14 = vpop.permute.xlu2 %595 }
 0x7d0   :  { %v598_v16 = vmul.f32 %v596_v14, %v590_v15 }
 0x7d2   :  { %600 = vrot.lane.b32.xlu1 %v598_v16, %s1483_s24 }
 0x7fb   :  { %v546_v29 = vpop.permute.xlu0 %545 }
 0x7fc   :  { %v548_v38 = vmul.f32 %v546_v29, %v540_v32 }
 0x7fe   :  { %550 = vrot.lane.b32.xlu2 %v548_v38, %s1483_s24 }
 0x81b   :  { %v133_v54 = vpop.f32.mrf.mxu0 }
 0x81c   :  { %v134_v58 = vadd.f32 %v1571_v7, %v133_v54 }
 0x823   :  { %v1710_v55 = vpop.f32.mrf.mxu0 }
 0x82b   :  { %v1712_v56 = vpop.f32.mrf.mxu0 }
 0x833   :  { %v1714_v57 = vpop.f32.mrf.mxu0 }
 0x844   :  { %v601_v39 = vpop.permute.xlu1 %600 }
 0x845   :  { %v1682_v41 = vadd.f32 %v601_v39, %v593_v31 }
 0x847   :  { %1375 = vtanh.f32 %v1682_v41 }
 0x84d   :  { %v1376_v42 = vpop.eup %1375 }
 0x84e   :  { %606 = vrot.lane.b32.xlu0 %v1376_v42, %s1480_s16 }
 0x858   :  { %v551_v43 = vpop.permute.xlu2 %550 }
 0x859   :  { %v1687_v44 = vadd.f32 %v551_v43, %v543_v26 }
 0x85b   :  { %1377 = vtanh.f32 %v1687_v44 }
 0x861   :  { %v1378_v45 = vpop.eup %1377 }
 0x862   :  { %556 = vrot.lane.b32.xlu1 %v1378_v45, %s1480_s16 }
 0x8c0   :  { %v607_v46 = vpop.permute.xlu0 %606 }
 0x8c1   :  { %v609_v48 = vmul.f32 %v607_v46, %v590_v15 }
 0x8c3   :  { %v610_v30 = vpack.c.bf16 %v609_v48, %v609_v48 }
 0x8c5   :  { %612 = vrot.lane.b32.xlu2 %v610_v30, %s1483_s24 }
 0x8d4   :  { %v557_v49 = vpop.permute.xlu1 %556 }
 0x8d5   :  { %v559_v50 = vmul.f32 %v557_v49, %v540_v32 }
 0x8d7   :  { %v630_v51 = vpack.c.bf16 %v559_v50, %v559_v50 }
 0x8d9   :  { %632 = vrot.lane.b32.xlu0 %v630_v51, %s1483_s24 }
 0x91f   :  { %v613_v52 = vpop.permute.xlu2 %612 }
 0x920   :  { %1280 = vmatmul.msk.bf16.vlgmr.msrb.gmra.mxu2 %vm155_vm6, %v613_v52  ;;  %1283 = vmatmul.msk.bf16.vlgmr.msrb.gmra.mxu0 %vm155_vm6, %v613_v52 }
 0x921   :  { %947 = vmatpush.bf16.msrb.mxu2 %v1549_v2  ;;  %1024 = vmatpush.bf16.msrb.mxu0 %v1580_v33 }
 0x925   :  { %948 = vmatpush.bf16.msrb.mxu2 %v1557_v5  ;;  %1025 = vmatpush.bf16.msrb.mxu0 %v1588_v35 }
 0x94b   :  { %v633_v53 = vpop.permute.xlu0 %632 }
 0x94c   :  { %1281 = vmatmul.msk.bf16.vlgmr.msrb.gmra.mxu3 %vm155_vm6, %v633_v53 }
 0x94d   :  { %1004 = vmatpush.bf16.msrb.mxu3 %v1585_v34 }
 0x951   :  { %1005 = vmatpush.bf16.msrb.mxu3 %v1594_v36 }
 0x99d   :  { %v696_v59 = vpop.f32.mrf.mxu0 }
 0x99e   :  { %v697_v60 = vadd.f32 %v696_v59, %v134_v58 }
 0x9a0   :  { %1379 = vtanh.f32 %v697_v60  ;;  %v1284_v9 = vmul.f32 -1.442695, %v697_v60 }
 0x9a3   :  { %v626_v61 = vpop.f32.mrf.mxu2 }
 0x9a4   :  { %v627_v1 = vadd.f32 %v1617_v47, %v626_v61 }
 0x9a5   :  { %v698_v62 = vpop.f32.mrf.mxu0 }
 0x9a6   :  { %v1380_v63 = vpop.eup %1379 }
 0x9a7   :  { %722 = vrot.lane.b32.xlu1 %v1380_v63, %s1480_s16 }
 0x9ab   :  { %v628_v0 = vpop.f32.mrf.mxu2 }
 0x9ac   :  { %v136_v0 = vadd.f32 %v1571_v7, %v1710_v55 }
 0x9cf   :  { %v646_v3 = vpop.f32.mrf.mxu3 }
 0x9d0   :  { %v647_v4 = vadd.f32 %v646_v3, %v627_v1 }
 0x9d2   :  { %1381 = vtanh.f32 %v647_v4  ;;  %v1282_v13 = vmul.f32 -1.442695, %v647_v4 }
 0x9d3   :  { %1383 = vpow2.f32 %v1284_v9 }
 0x9d7   :  { %v648_v6 = vpop.f32.mrf.mxu3 }
 0x9d8   :  { %v1382_v8 = vpop.eup %1381 }
 0x9d9   :  { %672 = vrot.lane.b32.xlu2 %v1382_v8, %s1480_s16  ;;  %v1384_v10 = vpop.eup %1383 }
 0x9da   :  { %v703_v11 = vadd.f32 1.0, %v1384_v10 }
 0x9dc   :  { %1385 = vrcp.f32 %v703_v11  ;;  %v715_v20 = vand.u32 2147483648, %v703_v11  ;;  %vm709_vm2 = vweird.f32 %v703_v11  ;;  %v713_v21 = vand.u32 2147483647, %v703_v11 }
 0x9dd   :  { %1387 = vpow2.f32 %v1282_v13 }
 0x9de   :  { %v716_v23 = vor.u32 1.1754944e-38, %v715_v20  ;;  %vm714_vm4 = vcmp.eq.f32.partialorder %v713_v21, 8.507059e+37 }
 0x9e2   :  { %v1386_v12 = vpop.eup %1385 }
 0x9e3   :  { %v705_v14 = vmul.f32 %v1386_v12, %v703_v11  ;;  %v1388_v17 = vpop.eup %1387  ;;  %vm710_vm1 = vweird.f32 %v1386_v12 }
 0x9e4   :  { %v653_v19 = vadd.f32 1.0, %v1388_v17  ;;  %vm711_vm3 = vmor %vm709_vm2, %vm710_vm1 }
 0x9e5   :  { %v706_v15 = vsub.f32 1.0, %v705_v14 }
 0x9e6   :  { %1389 = vrcp.f32 %v653_v19  ;;  %v665_v39 = vand.u32 2147483648, %v653_v19  ;;  %vm659_vm7 = vweird.f32 %v653_v19  ;;  %v663_v42 = vand.u32 2147483647, %v653_v19 }
 0x9e7   :  { %v707_v16 = vmul.f32 %v1386_v12, %v706_v15 }
 0x9e8   :  { %v666_v43 = vor.u32 1.1754944e-38, %v665_v39  ;;  %vm664_vm9 = vcmp.eq.f32.partialorder %v663_v42, 8.507059e+37 }
 0x9e9   :  { %v708_v18 = vadd.f32 %v1386_v12, %v707_v16 }
 0x9eb   :  { %v712_v22 = vsel %vm711_vm3, %v1386_v12, %v708_v18 }
 0x9ec   :  { %v717_v24 = vsel %vm714_vm4, %v716_v23, %v712_v22  ;;  %v1390_v28 = vpop.eup %1389 }
 0x9ed   :  { %v655_v29 = vmul.f32 %v1390_v28, %v653_v19  ;;  %vm660_vm5 = vweird.f32 %v1390_v28  ;;  %v720_v48 = vmul.f32 %v717_v24, %v1682_v41 }
 0x9ee   :  { %vm661_vm8 = vmor %vm659_vm7, %vm660_vm5 }
 0x9ef   :  { %v656_v32 = vsub.f32 1.0, %v655_v29 }
 0x9f1   :  { %v657_v38 = vmul.f32 %v1390_v28, %v656_v32 }
 0x9f3   :  { %v658_v31 = vadd.f32 %v1390_v28, %v657_v38 }
 0x9f5   :  { %v662_v26 = vsel %vm661_vm8, %v1390_v28, %v658_v31 }
 0x9f6   :  { %v667_v37 = vsel %vm664_vm9, %v666_v43, %v662_v26 }
 0x9f7   :  { %v670_v50 = vmul.f32 %v667_v37, %v1687_v44 }
 0xa19   :  { %v723_v25 = vpop.permute.xlu1 %722 }
 0xa1a   :  { %v725_v27 = vmul.f32 %v723_v25, %v717_v24 }
 0xa1c   :  { %727 = vrot.lane.b32.xlu0 %v725_v27, %s1483_s24 }
 0xa33   :  { %v673_v45 = vpop.permute.xlu2 %672 }
 0xa34   :  { %v675_v46 = vmul.f32 %v673_v45, %v667_v37 }
 0xa36   :  { %677 = vrot.lane.b32.xlu1 %v675_v46, %s1483_s24 }
 0xa8e   :  { %v728_v30 = vpop.permute.xlu0 %727 }
 0xa8f   :  { %v1723_v40 = vadd.f32 %v728_v30, %v720_v48 }
 0xa91   :  { %1391 = vtanh.f32 %v1723_v40 }
 0xa97   :  { %v1392_v49 = vpop.eup %1391 }
 0xa98   :  { %733 = vrot.lane.b32.xlu2 %v1392_v49, %s1480_s16 }
 0xaa8   :  { %v678_v51 = vpop.permute.xlu1 %677 }
 0xaa9   :  { %v1728_v52 = vadd.f32 %v678_v51, %v670_v50 }
 0xaab   :  { %1393 = vtanh.f32 %v1728_v52 }
 0xab1   :  { %v1394_v53 = vpop.eup %1393 }
 0xab2   :  { %683 = vrot.lane.b32.xlu0 %v1394_v53, %s1480_s16 }
 0xaf2   :  { %v734_v54 = vpop.permute.xlu2 %733 }
 0xaf3   :  { %v736_v41 = vmul.f32 %v734_v54, %v717_v24 }
 0xaf5   :  { %v737_v58 = vpack.c.bf16 %v736_v41, %v736_v41 }
 0xaf7   :  { %739 = vrot.lane.b32.xlu1 %v737_v58, %s1483_s24 }
 0xb24   :  { %v684_v59 = vpop.permute.xlu0 %683 }
 0xb25   :  { %v686_v60 = vmul.f32 %v684_v59, %v667_v37 }
 0xb27   :  { %v757_v61 = vpack.c.bf16 %v686_v60, %v686_v60 }
 0xb29   :  { %759 = vrot.lane.b32.xlu2 %v757_v61, %s1483_s24 }
 0xb69   :  { %v740_v62 = vpop.permute.xlu1 %739 }
 0xb6a   :  { %1285 = vmatmul.msk.bf16.vlgmr.msra.gmra.mxu1 %vm155_vm6, %v740_v62  ;;  %1288 = vmatmul.msk.bf16.vlgmr.msra.gmra.mxu3 %vm155_vm6, %v740_v62  ;;  %v1768_v62 = vld [vmem:[%s1827_s3] ss:$0 sm:$0xff] }
 0xb6b   :  { %1074 = vmatpush.bf16.msra.mxu1 %v1549_v2  ;;  %1151 = vmatpush.bf16.msra.mxu3 %v1580_v33 }
 0xb6f   :  { %1075 = vmatpush.bf16.msra.mxu1 %v1557_v5  ;;  %1152 = vmatpush.bf16.msra.mxu3 %v1588_v35 }
 0xb83   :  { %v760_v44 = vpop.permute.xlu2 %759 }
 0xb84   :  { %1286 = vmatmul.msk.bf16.vlgmr.msra.gmra.mxu2 %vm155_vm6, %v760_v44  ;;  %v139_v44 = vadd.f32 %v1768_v62, %v1712_v56 }
 0xb85   :  { %1131 = vmatpush.bf16.msra.mxu2 %v1585_v34 }
 0xb89   :  { %1132 = vmatpush.bf16.msra.mxu2 %v1594_v36 }
 0xbe7   :  { %v753_v63 = vpop.f32.mrf.mxu1 }
 0xbe8   :  { %v754_v5 = vadd.f32 %v1617_v47, %v753_v63 }
 0xbed   :  { %v823_v1 = vpop.f32.mrf.mxu3 }
 0xbee   :  { %v824_v3 = vadd.f32 %v823_v1, %v136_v0 }
 0xbef   :  { %v755_v2 = vpop.f32.mrf.mxu1 }
 0xbf0   :  { %1395 = vtanh.f32 %v824_v3  ;;  %v1289_v36 = vmul.f32 -1.442695, %v824_v3 }
 0xbf5   :  { %v825_v33 = vpop.f32.mrf.mxu3 }
 0xbf6   :  { %v1396_v4 = vpop.eup %1395 }
 0xbf7   :  { %849 = vrot.lane.b32.xlu0 %v1396_v4, %s1480_s16 }
 0xc07   :  { %v773_v35 = vpop.f32.mrf.mxu2 }
 0xc08   :  { %v774_v6 = vadd.f32 %v773_v35, %v754_v5 }
 0xc0a   :  { %1397 = vtanh.f32 %v774_v6  ;;  %v1287_v10 = vmul.f32 -1.442695, %v774_v6 }
 0xc0b   :  { %1399 = vpow2.f32 %v1289_v36 }
 0xc0f   :  { %v775_v34 = vpop.f32.mrf.mxu2 }
 0xc10   :  { %v1398_v8 = vpop.eup %1397 }
 0xc11   :  { %799 = vrot.lane.b32.xlu1 %v1398_v8, %s1480_s16  ;;  %v1400_v7 = vpop.eup %1399 }
 0xc12   :  { %v830_v55 = vadd.f32 1.0, %v1400_v7 }
 0xc14   :  { %1401 = vrcp.f32 %v830_v55  ;;  %v842_v17 = vand.u32 2147483648, %v830_v55  ;;  %vm836_vm11 = vweird.f32 %v830_v55  ;;  %v840_v18 = vand.u32 2147483647, %v830_v55 }
 0xc15   :  { %1403 = vpow2.f32 %v1287_v10 }
 0xc16   :  { %v843_v20 = vor.u32 1.1754944e-38, %v842_v17  ;;  %vm841_vm13 = vcmp.eq.f32.partialorder %v840_v18, 8.507059e+37 }
 0xc1a   :  { %v1402_v9 = vpop.eup %1401 }
 0xc1b   :  { %v832_v11 = vmul.f32 %v1402_v9, %v830_v55  ;;  %v1404_v14 = vpop.eup %1403  ;;  %vm837_vm10 = vweird.f32 %v1402_v9 }
 0xc1c   :  { %v780_v16 = vadd.f32 1.0, %v1404_v14  ;;  %vm838_vm12 = vmor %vm836_vm11, %vm837_vm10 }
 0xc1d   :  { %v833_v12 = vsub.f32 1.0, %v832_v11 }
 0xc1e   :  { %1405 = vrcp.f32 %v780_v16  ;;  %v792_v32 = vand.u32 2147483648, %v780_v16  ;;  %vm786_vm15 = vweird.f32 %v780_v16  ;;  %v790_v38 = vand.u32 2147483647, %v780_v16 }
 0xc1f   :  { %v834_v13 = vmul.f32 %v1402_v9, %v833_v12 }
 0xc20   :  { %v793_v39 = vor.u32 1.1754944e-38, %v792_v32  ;;  %vm791_vm1 = vcmp.eq.f32.partialorder %v790_v38, 8.507059e+37 }
 0xc21   :  { %v835_v15 = vadd.f32 %v1402_v9, %v834_v13 }
 0xc23   :  { %v839_v19 = vsel %vm838_vm12, %v1402_v9, %v835_v15 }
 0xc24   :  { %v844_v22 = vsel %vm841_vm13, %v843_v20, %v839_v19  ;;  %v1406_v24 = vpop.eup %1405 }
 0xc25   :  { %v782_v25 = vmul.f32 %v1406_v24, %v780_v16  ;;  %vm787_vm14 = vweird.f32 %v1406_v24  ;;  %v847_v45 = vmul.f32 %v844_v22, %v1723_v40 }
 0xc26   :  { %vm788_vm0 = vmor %vm786_vm15, %vm787_vm14 }
 0xc27   :  { %v783_v27 = vsub.f32 1.0, %v782_v25 }
 0xc29   :  { %v784_v28 = vmul.f32 %v1406_v24, %v783_v27 }
 0xc2b   :  { %v785_v29 = vadd.f32 %v1406_v24, %v784_v28 }
 0xc2d   :  { %v789_v31 = vsel %vm788_vm0, %v1406_v24, %v785_v29 }
 0xc2e   :  { %v794_v26 = vsel %vm791_vm1, %v793_v39, %v789_v31 }
 0xc2f   :  { %v797_v30 = vmul.f32 %v794_v26, %v1728_v52 }
 0xc69   :  { %v850_v21 = vpop.permute.xlu0 %849 }
 0xc6a   :  { %v852_v23 = vmul.f32 %v850_v21, %v844_v22 }
 0xc6c   :  { %854 = vrot.lane.b32.xlu2 %v852_v23, %s1483_s24 }
 0xc83   :  { %v800_v42 = vpop.permute.xlu1 %799 }
 0xc84   :  { %v802_v43 = vmul.f32 %v800_v42, %v794_v26 }
 0xc86   :  { %804 = vrot.lane.b32.xlu0 %v802_v43, %s1483_s24 }
 0xcc6   :  { %v855_v37 = vpop.permute.xlu2 %854 }
 0xcc7   :  { %v1751_v46 = vadd.f32 %v855_v37, %v847_v45 }
 0xcc9   :  { %1407 = vtanh.f32 %v1751_v46 }
 0xccf   :  { %v1408_v48 = vpop.eup %1407 }
 0xcd0   :  { %860 = vrot.lane.b32.xlu1 %v1408_v48, %s1480_s16 }
 0xcf8   :  { %v805_v49 = vpop.permute.xlu0 %804 }
 0xcf9   :  { %v1756_v50 = vadd.f32 %v805_v49, %v797_v30 }
 0xcfb   :  { %1409 = vtanh.f32 %v1756_v50 }
 0xd01   :  { %v1410_v51 = vpop.eup %1409 }
 0xd02   :  { %810 = vrot.lane.b32.xlu2 %v1410_v51, %s1480_s16 }
 0xd42   :  { %v861_v53 = vpop.permute.xlu1 %860 }
 0xd43   :  { %v863_v40 = vmul.f32 %v861_v53, %v844_v22 }
 0xd45   :  { %v864_v54 = vpack.c.bf16 %v863_v40, %v863_v40 }
 0xd47   :  { %866 = vrot.lane.b32.xlu0 %v864_v54, %s1483_s24 }
 0xd5c   :  { %v811_v41 = vpop.permute.xlu2 %810 }
 0xd5d   :  { %v813_v58 = vmul.f32 %v811_v41, %v794_v26 }
 0xd5f   :  { %v884_v59 = vpack.c.bf16 %v813_v58, %v813_v58  ;;  %v141_v58 = vadd.f32 %v1768_v62, %v1714_v57 }
 0xd61   :  { %886 = vrot.lane.b32.xlu1 %v884_v59, %s1483_s24 }
 0xdb9   :  { %v867_v60 = vpop.permute.xlu0 %866 }
 0xdba   :  { %1290 = vmatmul.msk.bf16.vlgmr.msra.gmra.mxu0 %vm155_vm6, %v867_v60  ;;  %1293 = vmatmul.msk.bf16.vlgmr.msrb.gmra.mxu2 %vm155_vm6, %v867_v60 }
 0xdd3   :  { %v887_v52 = vpop.permute.xlu1 %886 }
 0xdd4   :  { %1291 = vmatmul.msk.bf16.vlgmr.msrb.gmra.mxu1 %vm155_vm6, %v887_v52 }
 0xe37   :  { %v880_v61 = vpop.f32.mrf.mxu0 }
 0xe38   :  { %v881_v33 = vadd.f32 %v1617_v47, %v880_v61 }
 0xe3d   :  { %v950_v63 = vpop.f32.mrf.mxu2 }
 0xe3e   :  { %v951_v0 = vadd.f32 %v950_v63, %v139_v44 }
 0xe3f   :  { %v882_v1 = vpop.f32.mrf.mxu0 }
 0xe40   :  { %1411 = vtanh.f32 %v951_v0  ;;  %v1294_v34 = vmul.f32 -1.442695, %v951_v0  ;;  %v1798_v0 = vld [vmem:[%s1830_s6] ss:$0 sm:$0xff] }
 0xe45   :  { %v952_v3 = vpop.f32.mrf.mxu2 }
 0xe46   :  { %v1412_v2 = vpop.eup %1411 }
 0xe47   :  { %976 = vrot.lane.b32.xlu2 %v1412_v2, %s1480_s16 }
 0xe51   :  { %v900_v4 = vpop.f32.mrf.mxu1 }
 0xe52   :  { %v901_v5 = vadd.f32 %v900_v4, %v881_v33 }
 0xe54   :  { %1413 = vtanh.f32 %v901_v5  ;;  %v1292_v14 = vmul.f32 -1.442695, %v901_v5 }
 0xe55   :  { %1415 = vpow2.f32 %v1294_v34 }
 0xe59   :  { %v902_v35 = vpop.f32.mrf.mxu1 }
 0xe5a   :  { %v1414_v6 = vpop.eup %1413 }
 0xe5b   :  { %926 = vrot.lane.b32.xlu0 %v1414_v6, %s1480_s16  ;;  %v1416_v56 = vpop.eup %1415 }
 0xe5c   :  { %v957_v8 = vadd.f32 1.0, %v1416_v56 }
 0xe5e   :  { %1417 = vrcp.f32 %v957_v8  ;;  %v969_v11 = vand.u32 2147483648, %v957_v8  ;;  %vm963_vm3 = vweird.f32 %v957_v8  ;;  %v967_v47 = vand.u32 2147483647, %v957_v8 }
 0xe5f   :  { %1419 = vpow2.f32 %v1292_v14 }
 0xe60   :  { %v970_v13 = vor.u32 1.1754944e-38, %v969_v11  ;;  %vm968_vm5 = vcmp.eq.f32.partialorder %v967_v47, 8.507059e+37 }
 0xe64   :  { %v1418_v36 = vpop.eup %1417 }
 0xe65   :  { %v959_v7 = vmul.f32 %v1418_v36, %v957_v8  ;;  %vm964_vm2 = vweird.f32 %v1418_v36  ;;  %v1420_v18 = vpop.eup %1419 }
 0xe66   :  { %vm965_vm4 = vmor %vm963_vm3, %vm964_vm2  ;;  %v907_v19 = vadd.f32 1.0, %v1420_v18 }
 0xe67   :  { %v960_v55 = vsub.f32 1.0, %v959_v7 }
 0xe68   :  { %1421 = vrcp.f32 %v907_v19  ;;  %v919_v25 = vand.u32 2147483648, %v907_v19  ;;  %vm913_vm8 = vweird.f32 %v907_v19  ;;  %v917_v27 = vand.u32 2147483647, %v907_v19 }
 0xe69   :  { %v961_v9 = vmul.f32 %v1418_v36, %v960_v55 }
 0xe6a   :  { %v920_v29 = vor.u32 1.1754944e-38, %v919_v25  ;;  %vm918_vm10 = vcmp.eq.f32.partialorder %v917_v27, 8.507059e+37 }
 0xe6b   :  { %v962_v10 = vadd.f32 %v1418_v36, %v961_v9 }
 0xe6d   :  { %v966_v12 = vsel %vm965_vm4, %v1418_v36, %v962_v10 }
 0xe6e   :  { %v971_v15 = vsel %vm968_vm5, %v970_v13, %v966_v12  ;;  %v1422_v20 = vpop.eup %1421 }
 0xe6f   :  { %v909_v21 = vmul.f32 %v1422_v20, %v907_v19  ;;  %vm914_vm7 = vweird.f32 %v1422_v20  ;;  %v974_v39 = vmul.f32 %v971_v15, %v1751_v46 }
 0xe70   :  { %vm915_vm9 = vmor %vm913_vm8, %vm914_vm7  ;;  %vm1214_vm8 = vcmask 7168  }
 0xe71   :  { %v910_v22 = vsub.f32 1.0, %v909_v21 }
 0xe73   :  { %v911_v23 = vmul.f32 %v1422_v20, %v910_v22 }
 0xe75   :  { %v912_v24 = vadd.f32 %v1422_v20, %v911_v23 }
 0xe77   :  { %v916_v28 = vsel %vm915_vm9, %v1422_v20, %v912_v24 }
 0xe78   :  { %v921_v38 = vsel %vm918_vm10, %v920_v29, %v916_v28 }
 0xe79   :  { %v924_v45 = vmul.f32 %v921_v38, %v1756_v50 }
 0xea1   :  { %v977_v16 = vpop.permute.xlu2 %976 }
 0xea2   :  { %v979_v17 = vmul.f32 %v977_v16, %v971_v15 }
 0xea4   :  { %981 = vrot.lane.b32.xlu1 %v979_v17, %s1483_s24 }
 0xecd   :  { %v927_v32 = vpop.permute.xlu0 %926 }
 0xece   :  { %v929_v31 = vmul.f32 %v927_v32, %v921_v38 }
 0xed0   :  { %931 = vrot.lane.b32.xlu2 %v929_v31, %s1483_s24 }
 0xf16   :  { %v982_v42 = vpop.permute.xlu1 %981 }
 0xf17   :  { %v1778_v26 = vadd.f32 %v982_v42, %v974_v39 }
 0xf19   :  { %1423 = vtanh.f32 %v1778_v26 }
 0xf1f   :  { %v1424_v43 = vpop.eup %1423 }
 0xf20   :  { %987 = vrot.lane.b32.xlu0 %v1424_v43, %s1480_s16 }
 0xf2a   :  { %v932_v37 = vpop.permute.xlu2 %931 }
 0xf2b   :  { %v1783_v48 = vadd.f32 %v932_v37, %v924_v45 }
 0xf2d   :  { %1425 = vtanh.f32 %v1783_v48 }
 0xf33   :  { %v1426_v30 = vpop.eup %1425 }
 0xf34   :  { %937 = vrot.lane.b32.xlu1 %v1426_v30, %s1480_s16 }
 0xf92   :  { %v988_v49 = vpop.permute.xlu0 %987 }
 0xf93   :  { %v990_v46 = vmul.f32 %v988_v49, %v971_v15 }
 0xf95   :  { %v991_v51 = vpack.c.bf16 %v990_v46, %v990_v46 }
 0xf97   :  { %993 = vrot.lane.b32.xlu2 %v991_v51, %s1483_s24 }
 0xfa6   :  { %v938_v53 = vpop.permute.xlu1 %937 }
 0xfa7   :  { %v940_v40 = vmul.f32 %v938_v53, %v921_v38 }
 0xfa9   :  { %v1011_v54 = vpack.c.bf16 %v940_v40, %v940_v40 }
 0xfab   :  { %1013 = vrot.lane.b32.xlu0 %v1011_v54, %s1483_s24 }
 0xff1   :  { %v994_v41 = vpop.permute.xlu2 %993 }
 0xff2   :  { %1295 = vmatmul.msk.bf16.vlgmr.msrb.gmra.mxu3 %vm155_vm6, %v994_v41  ;;  %1298 = vmatmul.msk.bf16.vlgmr.msra.gmra.mxu1 %vm155_vm6, %v994_v41 }
0x101d   :  { %v1014_v50 = vpop.permute.xlu0 %1013 }
0x101e   :  { %1296 = vmatmul.msk.bf16.vlgmr.msrb.gmra.mxu0 %vm155_vm6, %v1014_v50 }
0x106f   :  { %v1077_v59 = vpop.f32.mrf.mxu1 }
0x1070   :  { %v1078_v60 = vadd.f32 %v1077_v59, %v141_v58 }
0x1072   :  { %1427 = vtanh.f32 %v1078_v60  ;;  %v1299_v33 = vmul.f32 -1.442695, %v1078_v60 }
0x1075   :  { %v1007_v52 = vpop.f32.mrf.mxu3 }
0x1076   :  { %v1008_v1 = vadd.f32 %v1798_v0, %v1007_v52 }
0x1077   :  { %v1079_v61 = vpop.f32.mrf.mxu1 }
0x1078   :  { %v1428_v44 = vpop.eup %1427 }
0x1079   :  { %1103 = vrot.lane.b32.xlu1 %v1428_v44, %s1480_s16  ;;  %v1321_v44 = vld [vmem:[%s1831_s7] ss:$0 sm:$0xff] }
0x107d   :  { %v1009_v63 = vpop.f32.mrf.mxu3 }
0x109b   :  { %v1027_v3 = vpop.f32.mrf.mxu0 }
0x109c   :  { %v1028_v2 = vadd.f32 %v1027_v3, %v1008_v1 }
0x109e   :  { %1429 = vtanh.f32 %v1028_v2  ;;  %v1297_v35 = vmul.f32 -1.442695, %v1028_v2 }
0x109f   :  { %1431 = vpow2.f32 %v1299_v33 }
0x10a3   :  { %v1029_v57 = vpop.f32.mrf.mxu0 }
0x10a4   :  { %v1430_v62 = vpop.eup %1429 }
0x10a5   :  { %1053 = vrot.lane.b32.xlu2 %v1430_v62, %s1480_s16  ;;  %v1432_v4 = vpop.eup %1431 }
0x10a6   :  { %v1084_v5 = vadd.f32 1.0, %v1432_v4 }
0x10a8   :  { %1433 = vrcp.f32 %v1084_v5  ;;  %v1096_v9 = vand.u32 2147483648, %v1084_v5  ;;  %vm1090_vm12 = vweird.f32 %v1084_v5  ;;  %v1094_v10 = vand.u32 2147483647, %v1084_v5 }
0x10a9   :  { %1435 = vpow2.f32 %v1297_v35 }
0x10aa   :  { %v1097_v12 = vor.u32 1.1754944e-38, %v1096_v9  ;;  %vm1095_vm14 = vcmp.eq.f32.partialorder %v1094_v10, 8.507059e+37 }
0x10ae   :  { %v1434_v6 = vpop.eup %1433 }
0x10af   :  { %v1086_v34 = vmul.f32 %v1434_v6, %v1084_v5  ;;  %v1436_v56 = vpop.eup %1435  ;;  %vm1091_vm11 = vweird.f32 %v1434_v6 }
0x10b0   :  { %v1034_v36 = vadd.f32 1.0, %v1436_v56  ;;  %vm1092_vm13 = vmor %vm1090_vm12, %vm1091_vm11 }
0x10b1   :  { %v1087_v8 = vsub.f32 1.0, %v1086_v34 }
0x10b2   :  { %1437 = vrcp.f32 %v1034_v36  ;;  %v1046_v20 = vand.u32 2147483648, %v1034_v36  ;;  %vm1040_vm0 = vweird.f32 %v1034_v36  ;;  %v1044_v21 = vand.u32 2147483647, %v1034_v36 }
0x10b3   :  { %v1088_v7 = vmul.f32 %v1434_v6, %v1087_v8 }
0x10b4   :  { %v1047_v23 = vor.u32 1.1754944e-38, %v1046_v20  ;;  %vm1045_vm2 = vcmp.eq.f32.partialorder %v1044_v21, 8.507059e+37 }
0x10b5   :  { %v1089_v55 = vadd.f32 %v1434_v6, %v1088_v7 }
0x10b7   :  { %v1093_v11 = vsel %vm1092_vm13, %v1434_v6, %v1089_v55 }
0x10b8   :  { %v1438_v47 = vpop.eup %1437  ;;  %v1098_v14 = vsel %vm1095_vm14, %v1097_v12, %v1093_v11  ;;  %v1322_v12 = vld [vmem:[#allocation2] ss:$0 sm:$0xff] }
0x10b9   :  { %v1036_v16 = vmul.f32 %v1438_v47, %v1034_v36  ;;  %vm1041_vm15 = vweird.f32 %v1438_v47  ;;  %v1101_v28 = vmul.f32 %v1098_v14, %v1778_v26 }
0x10ba   :  { %vm1042_vm1 = vmor %vm1040_vm0, %vm1041_vm15 }
0x10bb   :  { %v1037_v17 = vsub.f32 1.0, %v1036_v16 }
0x10bd   :  { %v1038_v18 = vmul.f32 %v1438_v47, %v1037_v17 }
0x10bf   :  { %v1039_v19 = vadd.f32 %v1438_v47, %v1038_v18 }
0x10c1   :  { %v1043_v22 = vsel %vm1042_vm1, %v1438_v47, %v1039_v19 }
0x10c2   :  { %v1048_v25 = vsel %vm1045_vm2, %v1047_v23, %v1043_v22 }
0x10c3   :  { %v1051_v31 = vmul.f32 %v1048_v25, %v1783_v48 }
0x10eb   :  { %v1104_v13 = vpop.permute.xlu1 %1103 }
0x10ec   :  { %v1106_v15 = vmul.f32 %v1104_v13, %v1098_v14 }
0x10ee   :  { %1108 = vrot.lane.b32.xlu0 %v1106_v15, %s1483_s24 }
0x10ff   :  { %v1054_v24 = vpop.permute.xlu2 %1053 }
0x1100   :  { %v1056_v27 = vmul.f32 %v1054_v24, %v1048_v25 }
0x1102   :  { %1058 = vrot.lane.b32.xlu1 %v1056_v27, %s1483_s24 }
0x1160   :  { %v1109_v29 = vpop.permute.xlu0 %1108 }
0x1161   :  { %v1111_v32 = vadd.f32 %v1109_v29, %v1101_v28 }
0x1163   :  { %1439 = vtanh.f32 %v1111_v32 }
0x1169   :  { %v1440_v38 = vpop.eup %1439 }
0x116a   :  { %1114 = vrot.lane.b32.xlu2 %v1440_v38, %s1480_s16 }
0x1174   :  { %v1059_v39 = vpop.permute.xlu1 %1058 }
0x1175   :  { %v1061_v42 = vadd.f32 %v1059_v39, %v1051_v31 }
0x1177   :  { %1441 = vtanh.f32 %v1061_v42 }
0x117d   :  { %v1442_v43 = vpop.eup %1441 }
0x117e   :  { %1064 = vrot.lane.b32.xlu0 %v1442_v43, %s1480_s16 }
0x11c4   :  { %v1115_v45 = vpop.permute.xlu2 %1114 }
0x11c5   :  { %v1117_v37 = vmul.f32 %v1115_v45, %v1098_v14 }
0x11c7   :  { %v1118_v30 = vpack.c.bf16 %v1117_v37, %v1117_v37 }
0x11c9   :  { %1120 = vrot.lane.b32.xlu1 %v1118_v30, %s1483_s24 }
0x11f0   :  { %v1065_v26 = vpop.permute.xlu0 %1064 }
0x11f1   :  { %v1067_v49 = vmul.f32 %v1065_v26, %v1048_v25 }
0x11f3   :  { %v1138_v46 = vpack.c.bf16 %v1067_v49, %v1067_v49 }
0x11f5   :  { %1140 = vrot.lane.b32.xlu2 %v1138_v46, %s1483_s24 }
0x123b   :  { %v1121_v51 = vpop.permute.xlu1 %1120 }
0x123c   :  { %1300 = vmatmul.msk.bf16.vlgmr.msra.gmra.mxu2 %vm155_vm6, %v1121_v51 }
0x124f   :  { %v1141_v48 = vpop.permute.xlu2 %1140 }
0x1250   :  { %1301 = vmatmul.msk.bf16.vlgmr.msra.gmra.mxu3 %vm155_vm6, %v1141_v48 }
0x12bf   :  { %v1134_v53 = vpop.f32.mrf.mxu2 }
0x12c0   :  { %v1135_v54 = vadd.f32 %v1798_v0, %v1134_v53 }
0x12c7   :  { %v1136_v40 = vpop.f32.mrf.mxu2 }
0x12d3   :  { %v1154_v41 = vpop.f32.mrf.mxu3 }
0x12d4   :  { %v1155_v50 = vadd.f32 %v1154_v41, %v1135_v54 }
0x12d6   :  { %1443 = vtanh.f32 %v1155_v50  ;;  %v1302_v60 = vmul.f32 -1.442695, %v1155_v50 }
0x12d8   :  { %1445 = vpow2.f32 %v1302_v60 }
0x12db   :  { %v1156_v58 = vpop.f32.mrf.mxu3 }
0x12dc   :  { %v1444_v59 = vpop.eup %1443 }
0x12dd   :  { %1180 = vrot.lane.b32.xlu0 %v1444_v59, %s1480_s16 }
0x12de   :  { %v1446_v52 = vpop.eup %1445 }
0x12df   :  { %v1161_v61 = vadd.f32 1.0, %v1446_v52 }
0x12e1   :  { %1447 = vrcp.f32 %v1161_v61  ;;  %v1173_v57 = vand.u32 2147483648, %v1161_v61  ;;  %vm1167_vm4 = vweird.f32 %v1161_v61  ;;  %v1171_v62 = vand.u32 2147483647, %v1161_v61 }
0x12e3   :  { %v1174_v4 = vor.u32 1.1754944e-38, %v1173_v57  ;;  %vm1172_vm7 = vcmp.eq.f32.partialorder %v1171_v62, 8.507059e+37 }
0x12e5   :  { %1198 = vrot.lane.b32.xlu0 %v1321_v44, %s1484_s8 }
0x12e7   :  { %v1448_v63 = vpop.eup %1447 }
0x12e8   :  { %v1163_v0 = vmul.f32 %v1448_v63, %v1161_v61  ;;  %vm1168_vm3 = vweird.f32 %v1448_v63 }
0x12e9   :  { %vm1169_vm5 = vmor %vm1167_vm4, %vm1168_vm3 }
0x12ea   :  { %v1164_v1 = vsub.f32 1.0, %v1163_v0 }
0x12ec   :  { %v1165_v3 = vmul.f32 %v1448_v63, %v1164_v1 }
0x12ee   :  { %v1166_v2 = vadd.f32 %v1448_v63, %v1165_v3 }
0x12f0   :  { %v1170_v33 = vsel %vm1169_vm5, %v1448_v63, %v1166_v2 }
0x12f1   :  { %v1175_v35 = vsel %vm1172_vm7, %v1174_v4, %v1170_v33 }
0x12f2   :  { %v1178_v34 = vmul.f32 %v1175_v35, %v1061_v42 }
0x134f   :  { %v1181_v5 = vpop.permute.xlu0 %1180 }
0x1350   :  { %v1183_v6 = vmul.f32 %v1181_v5, %v1175_v35 }
0x1352   :  { %1185 = vrot.lane.b32.xlu1 %v1183_v6, %s1483_s24 }
0x1357   :  { %v1199_v55 = vpop.permute.xlu0 %1198 }
0x13c4   :  { %v1186_v56 = vpop.permute.xlu1 %1185 }
0x13c5   :  { %v1188_v8 = vadd.f32 %v1186_v56, %v1178_v34 }
0x13c7   :  { %1449 = vtanh.f32 %v1188_v8 }
0x13cd   :  { %v1450_v36 = vpop.eup %1449 }
0x13ce   :  { %1191 = vrot.lane.b32.xlu2 %v1450_v36, %s1480_s16 }
0x1428   :  { %v1192_v7 = vpop.permute.xlu2 %1191 }
0x1429   :  { %v1194_v9 = vmul.f32 %v1192_v7, %v1175_v35 }
0x142b   :  { %v1201_v10 = vmul.f32 %v1199_v55, %v1194_v9 }
0x142d   :  { %1203 = vrot.lane.b32.xlu1 %v1201_v10, %s1483_s24 }
0x149f   :  { %v1204_v11 = vpop.permute.xlu1 %1203 }
0x14a0   :  { %v1206_v47 = vsel %vm155_vm6, %v1204_v11, 0.0 }
0x14a1   :  { %1207 = vadd.xlane.f32.xlu2 %v1206_v47 }
0x1514   :  { %v1208_v13 = vpop.xlane.xlu2 %1207 }
0x1515   :  { %v1213_v14 = vadd.f32 %v1322_v12, %v1208_v13 }
0x1517   :  { %1215 = vst.msk [vmem:[%s1833_s9] sm:$0xff] %vm1214_vm8, %v1213_v14 }
0x1518   :  { %1220 = vsyncpa [#allocation4], 1 }

</bundles_post_ra>
